<compile_context>
chip_gen: v5e
topology: v5e:2x2
jax: 0.10.0
libtpu: 0.0.40
codegen_flags: <defaults>
</compile_context>

<pallas_src>
import functools

import numpy as np
import jax
import jax.numpy as jnp
from jax import lax
from jax.experimental import pallas as pl
from jax.experimental.pallas import tpu as pltpu

EPS = 1e-5
LANE = 128


def _round_up(x, m):
    return (x + m - 1) // m * m


def _pick_row_block(hout, wout, target_rows=512):
    """Largest divisor of hout whose flat block (rb*wout rows) stays ~<= target."""
    cap = max(1, target_rows // max(wout, 1))
    best = 1
    for d in range(1, hout + 1):
        if hout % d == 0 and d <= cap:
            best = d
    return best


def _vmem_limit():
    """Per-generation VMEM request with headroom (v7x ~52MiB, v5e/v6e ~109MiB)."""
    try:
        cap = int(pltpu.get_tpu_info().vmem_capacity_bytes)
    except Exception:
        return None
    return max(32 << 20, min(cap - (12 << 20), int(cap * 0.85)))


# --------------------------------- kernel ------------------------------------

def _fused_residual_kernel(*refs, packed, has_downsample, stride, Hout, Wout,
                           rb, Cg, eps):
    it = iter(refs)
    x_ref = next(it)        # packed: (1, HW, 128) bf16 | phases: (1, s*s, Hp, Wp, Cin_p) bf16
    w1_ref = next(it)       # packed: (128, Cp)         | phases: (9, Cin_p, Cp)
    w2_ref = next(it)       # (9, Cp, Cp)
    wd_ref = next(it) if has_downsample else None
    skip_ref = None if has_downsample else next(it)     # (1, HW, Cp) f32 identity skip
    p1_ref = next(it)       # (3, Cp): bias / gamma / beta
    p2_ref = next(it)
    pd_ref = next(it) if has_downsample else None
    c2g_ref = next(it)      # (Cp, Gp) one-hot channel->group
    g2c_ref = next(it)      # (Gp, Cp)
    out_ref = next(it)      # (1, HW, Cp)
    y1pad_ref = next(it)    # (Hout+2, Wout+2, Cp) bf16: y1 with zero halo
    pn_ref = next(it)       # (HW, Cp) bf16: pre-norm staging (reused by both stages)

    f32 = jnp.float32
    HW = Hout * Wout
    Cp = out_ref.shape[-1]
    nblk = Hout // rb
    blk = rb * Wout
    inv_cnt = 1.0 / float(HW * Cg)           # GroupNorm count uses REAL group width

    def flat_start(i):
        st = i * blk
        if blk % 8 == 0:                       # sublane-aligned hint when possible
            st = pl.multiple_of(st, 8)
        return st

    def block_stats(acc):                      # (2, Cp): [sum ; sumsq]
        return jnp.concatenate([jnp.sum(acc, axis=0, keepdims=True),
                                jnp.sum(acc * acc, axis=0, keepdims=True)], axis=0)

    def gn_affine(stats, prm_ref):
        """stats (2,Cp) over HW -> per-channel (scale, shift) for one fused pass."""
        g = jnp.dot(stats, c2g_ref[...], preferred_element_type=f32)     # (2, Gp)
        g_mean = g[0:1, :] * inv_cnt
        # TODO(synk): two-pass / mean-subtracted variance if cancellation ever bites
        g_var = g[1:2, :] * inv_cnt - g_mean * g_mean
        g_inv = lax.rsqrt(g_var + eps)
        cc = jnp.dot(jnp.concatenate([g_mean, g_inv], axis=0), g2c_ref[...],
                     preferred_element_type=f32)                          # (2, Cp)
        scale = cc[1:2, :] * prm_ref[1:2, :]
        shift = prm_ref[2:3, :] - cc[0:1, :] * scale
        return scale, shift

    # ---- zero only the 1-pixel halo ring (interior is fully overwritten) ------
    y1pad_ref[0:1, :, :] = jnp.zeros((1, Wout + 2, Cp), y1pad_ref.dtype)
    y1pad_ref[Hout + 1:Hout + 2, :, :] = jnp.zeros((1, Wout + 2, Cp), y1pad_ref.dtype)
    y1pad_ref[:, 0:1, :] = jnp.zeros((Hout + 2, 1, Cp), y1pad_ref.dtype)
    y1pad_ref[:, Wout + 1:Wout + 2, :] = jnp.zeros((Hout + 2, 1, Cp), y1pad_ref.dtype)

    # ---- stage-1 conv (3x3, stride) on one row block ---------------------------
    def conv1_block(i):
        if packed:
            lhs = x_ref[0, pl.ds(flat_start(i), blk), :]          # (blk, 128) bf16
            acc = jnp.dot(lhs, w1_ref[...], preferred_element_type=f32)
        else:
            r0 = i * rb
            acc = jnp.zeros((blk, Cp), f32)
            for dy in range(3):
                for dx in range(3):
                    ph = (dy % stride) * stride + (dx % stride)
                    win = x_ref[0, ph, pl.ds(r0 + dy // stride, rb),
                                pl.ds(dx // stride, Wout), :]
                    acc = acc + jnp.dot(win.reshape(blk, win.shape[-1]),
                                        w1_ref[dy * 3 + dx],
                                        preferred_element_type=f32)
        return acc + p1_ref[0:1, :]

    # ---- skip 1x1 conv (stride s) on one row block -----------------------------
    def skip_conv_block(i):
        if packed:
            lhs = x_ref[0, pl.ds(flat_start(i), blk), :]   # center-tap rows in wd slab
        else:
            sph = (1 % stride) * stride + (1 % stride)
            soff = 1 // stride
            win = x_ref[0, sph, pl.ds(soff + i * rb, rb), pl.ds(soff, Wout), :]
            lhs = win.reshape(blk, win.shape[-1])
        return jnp.dot(lhs, wd_ref[...], preferred_element_type=f32) + pd_ref[0:1, :]

    # ---- pass A: conv1 + bias -> bf16 staging + GN1 sum/sumsq ------------------
    def body_a(i, stats):
        acc = conv1_block(i)
        pn_ref[pl.ds(flat_start(i), blk), :] = acc.astype(pn_ref.dtype)
        return stats + block_stats(acc)

    stats1 = lax.fori_loop(0, nblk, body_a, jnp.zeros((2, Cp), f32))
    scale1, shift1 = gn_affine(stats1, p1_ref)

    # ---- pass B: apply GN1 + ReLU into the haloed y1 buffer --------------------
    def body_b(i, c):
        v = pn_ref[pl.ds(flat_start(i), blk), :].astype(f32)
        v = jnp.maximum(v * scale1 + shift1, 0.0)
        y1pad_ref[pl.ds(1 + i * rb, rb), pl.ds(1, Wout), :] = (
            v.reshape(rb, Wout, Cp).astype(y1pad_ref.dtype))
        return c

    lax.fori_loop(0, nblk, body_b, 0)

    # ---- pass C: conv2 + bias -> staging; accumulate GN2 (and GN3) stats -------
    def body_c(i, carry):
        stats2, statsd = carry
        r0 = i * rb
        acc = jnp.zeros((blk, Cp), f32)
        for dy in range(3):
            for dx in range(3):
                win = y1pad_ref[pl.ds(r0 + dy, rb), pl.ds(dx, Wout), :]
                acc = acc + jnp.dot(win.reshape(blk, Cp), w2_ref[dy * 3 + dx],
                                    preferred_element_type=f32)
        acc = acc + p2_ref[0:1, :]
        pn_ref[pl.ds(flat_start(i), blk), :] = acc.astype(pn_ref.dtype)
        stats2 = stats2 + block_stats(acc)
        if has_downsample:
            statsd = statsd + block_stats(skip_conv_block(i))
        return (stats2, statsd)

    stats2, statsd = lax.fori_loop(
        0, nblk, body_c, (jnp.zeros((2, Cp), f32), jnp.zeros((2, Cp), f32)))
    scale2, shift2 = gn_affine(stats2, p2_ref)
    if has_downsample:
        scale_d, shift_d = gn_affine(statsd, pd_ref)

    # ---- pass D: GN2+ReLU, skip (recomputed conv+GN3 | identity f32), add ------
    def body_d(i, c):
        fs = flat_start(i)
        y2 = pn_ref[pl.ds(fs, blk), :].astype(f32)
        y2 = jnp.maximum(y2 * scale2 + shift2, 0.0)
        if has_downsample:
            sk = skip_conv_block(i) * scale_d + shift_d
        else:
            sk = skip_ref[0, pl.ds(fs, blk), :]
        out_ref[0, pl.ds(fs, blk), :] = jnp.maximum(sk + y2, 0.0).astype(out_ref.dtype)
        return c

    lax.fori_loop(0, nblk, body_d, 0)


# ------------------------------- host wrapper ---------------------------------

def residual_block_pallas(x_nchw, params, *, stride):
    """Forward of ResidualBlock (norm_fn='group'). x_nchw: (N, Cin, H, W) f32."""
    N, Cin, H, W = x_nchw.shape
    planes = params["w1"].shape[0]
    num_groups = planes // 8
    Cg = planes // num_groups
    has_downsample = not (stride == 1 and Cin == planes)

    Cp = _round_up(planes, LANE)
    assert Cp % Cg == 0
    Gp = Cp // Cg
    s = stride
    Hout = (H - 1) // s + 1
    Wout = (W - 1) // s + 1
    HW = Hout * Wout
    rb = _pick_row_block(Hout, Wout)
    packed = (9 * Cin <= LANE)

    x_nhwc = jnp.transpose(x_nchw, (0, 2, 3, 1)).astype(jnp.float32)

    def pack_affine(b, g, be):                       # (3, Cp): bias / gamma / beta
        padw = (0, Cp - planes)
        return jnp.stack([jnp.pad(params[b], padw),
                          jnp.pad(params[g], padw),
                          jnp.pad(params[be], padw)]).astype(jnp.float32)

    p1 = pack_affine("b1", "g1", "be1")
    p2 = pack_affine("b2", "g2", "be2")
    # One-hot channel<->group maps; padded channels land in dummy groups whose
    # gamma/beta are zero so they stay identically zero end to end.
    c2g = jax.nn.one_hot(jnp.arange(Cp) // Cg, Gp, dtype=jnp.float32)    # (Cp, Gp)
    g2c = c2g.T

    # conv2 weights: per-tap (Cp, Cp) slabs, bf16 for the MXU.
    w2m = jnp.transpose(params["w2"], (2, 3, 1, 0))
    w2m = jnp.pad(w2m, ((0, 0), (0, 0), (0, Cp - planes), (0, Cp - planes)))
    w2m = w2m.reshape(9, Cp, Cp).astype(jnp.bfloat16)

    const = dict(pipeline_mode=pl.Buffered(1))       # grid-constant blocks: no double-buffer

    args, in_specs = [], []

    if packed:
        # K-packed conv1: 9 taps * Cin real channels along one 128-wide contraction.
        K1p = LANE
        xpad = jnp.pad(x_nhwc, ((0, 0), (1, 1), (1, 1), (0, 0)))
        taps = [xpad[:, dy:dy + (Hout - 1) * s + 1:s, dx:dx + (Wout - 1) * s + 1:s, :]
                for dy in range(3) for dx in range(3)]
        xim = jnp.concatenate(taps, axis=-1)                       # (N, Hout, Wout, 9*Cin)
        xim = jnp.pad(xim, ((0, 0), (0, 0), (0, 0), (0, K1p - 9 * Cin)))
        xim = xim.reshape(N, HW, K1p).astype(jnp.bfloat16)
        args.append(xim)
        in_specs.append(pl.BlockSpec((1, HW, K1p), lambda n: (n, 0, 0)))

        w1p = jnp.transpose(params["w1"], (2, 3, 1, 0)).reshape(9 * Cin, planes)
        w1p = jnp.pad(w1p, ((0, K1p - 9 * Cin), (0, Cp - planes))).astype(jnp.bfloat16)
        args.append(w1p)
        in_specs.append(pl.BlockSpec((K1p, Cp), lambda n: (0, 0), **const))
    else:
        # space-to-depth "phases": strided 3x3 taps become unit-stride slices.
        Cin_p = _round_up(Cin, LANE)
        Hp_tot = _round_up(H + 2, s)
        Wp_tot = _round_up(W + 2, s)
        xpad = jnp.pad(x_nhwc, ((0, 0), (1, Hp_tot - H - 1), (1, Wp_tot - W - 1),
                                (0, Cin_p - Cin)))
        Hp, Wp = Hp_tot // s, Wp_tot // s
        xph = xpad.reshape(N, Hp, s, Wp, s, Cin_p).transpose(0, 2, 4, 1, 3, 5)
        xph = xph.reshape(N, s * s, Hp, Wp, Cin_p).astype(jnp.bfloat16)
        args.append(xph)
        in_specs.append(pl.BlockSpec((1, s * s, Hp, Wp, Cin_p),
                                     lambda n: (n, 0, 0, 0, 0)))

        w1m = jnp.transpose(params["w1"], (2, 3, 1, 0))
        w1m = jnp.pad(w1m, ((0, 0), (0, 0), (0, Cin_p - Cin), (0, Cp - planes)))
        w1m = w1m.reshape(9, Cin_p, Cp).astype(jnp.bfloat16)
        args.append(w1m)
        in_specs.append(pl.BlockSpec((9, Cin_p, Cp), lambda n: (0, 0, 0), **const))

    args.append(w2m)
    in_specs.append(pl.BlockSpec((9, Cp, Cp), lambda n: (0, 0, 0), **const))

    if has_downsample:
        wd2 = params["wd"].reshape(planes, Cin).T                  # (Cin, planes)
        if packed:
            wdm = jnp.zeros((LANE, Cp), jnp.float32)
            wdm = wdm.at[4 * Cin:5 * Cin, :planes].set(wd2)        # center-tap rows only
            kd = LANE
        else:
            Cin_p = _round_up(Cin, LANE)
            wdm = jnp.pad(wd2, ((0, Cin_p - Cin), (0, Cp - planes)))
            kd = Cin_p
        args.append(wdm.astype(jnp.bfloat16))
        in_specs.append(pl.BlockSpec((kd, Cp), lambda n: (0, 0), **const))
    else:
        # identity skip stays f32: don't round the residual through bf16.
        skip_in = jnp.pad(x_nhwc, ((0, 0), (0, 0), (0, 0), (0, Cp - Cin)))
        skip_in = skip_in.reshape(N, HW, Cp).astype(jnp.float32)
        args.append(skip_in)
        in_specs.append(pl.BlockSpec((1, HW, Cp), lambda n: (n, 0, 0)))

    args += [p1, p2]
    in_specs.append(pl.BlockSpec((3, Cp), lambda n: (0, 0), **const))
    in_specs.append(pl.BlockSpec((3, Cp), lambda n: (0, 0), **const))
    if has_downsample:
        args.append(pack_affine("bd", "gd", "bed"))
        in_specs.append(pl.BlockSpec((3, Cp), lambda n: (0, 0), **const))
    args += [c2g, g2c]
    in_specs.append(pl.BlockSpec((Cp, Gp), lambda n: (0, 0), **const))
    in_specs.append(pl.BlockSpec((Gp, Cp), lambda n: (0, 0), **const))

    kernel = functools.partial(
        _fused_residual_kernel, packed=packed, has_downsample=has_downsample,
        stride=s, Hout=Hout, Wout=Wout, rb=rb, Cg=Cg, eps=EPS)

    out = pl.pallas_call(
        kernel,
        out_shape=jax.ShapeDtypeStruct((N, HW, Cp), jnp.float32),
        grid_spec=pltpu.PrefetchScalarGridSpec(
            num_scalar_prefetch=0,
            grid=(N,),
            in_specs=in_specs,
            out_specs=pl.BlockSpec((1, HW, Cp), lambda n: (n, 0, 0)),
            scratch_shapes=[
                pltpu.VMEM((Hout + 2, Wout + 2, Cp), jnp.bfloat16),   # haloed y1 (bf16)
                pltpu.VMEM((HW, Cp), jnp.bfloat16),                   # pre-norm staging
            ]),
        compiler_params=pltpu.CompilerParams(
            dimension_semantics=("parallel",),        # v7x: 2 TCs share the batch
            vmem_limit_bytes=_vmem_limit()),
    )(*args)

    out = out.reshape(N, Hout, Wout, Cp)[:, :, :, :planes]
    return jnp.transpose(out, (0, 3, 1, 2))           # back to NCHW


# ----------------------------- pure-JAX reference ------------------------------

def residual_block_ref(x, params, *, stride):
    planes = params["w1"].shape[0]
    num_groups = planes // 8
    Cin = x.shape[1]
    has_downsample = not (stride == 1 and Cin == planes)

    def conv(x, w, b, s, pad):
        out = lax.conv_general_dilated(x, w, (s, s), ((pad, pad), (pad, pad)),
                                       dimension_numbers=("NCHW", "OIHW", "NCHW"))
        return out + b[None, :, None, None]

    def gn(x, gamma, beta):
        N, C, H, W = x.shape
        xg = x.reshape(N, num_groups, (C // num_groups) * H * W)
        m = xg.mean(-1, keepdims=True)
        v = ((xg - m) ** 2).mean(-1, keepdims=True)
        xn = ((xg - m) * lax.rsqrt(v + EPS)).reshape(N, C, H, W)
        return xn * gamma[None, :, None, None] + beta[None, :, None, None]

    y = jax.nn.relu(gn(conv(x, params["w1"], params["b1"], stride, 1),
                       params["g1"], params["be1"]))
    y = jax.nn.relu(gn(conv(y, params["w2"], params["b2"], 1, 1),
                       params["g2"], params["be2"]))
    if has_downsample:
        xs = gn(conv(x, params["wd"], params["bd"], stride, 0),
                params["gd"], params["bed"])
    else:
        xs = x
    return jax.nn.relu(xs + y)


# ----------------------------- params / main ----------------------------------

def make_params(key, in_planes, planes, has_downsample):
    ks = jax.random.split(key, 12)
    p = {
        "w1": 0.1 * jax.random.normal(ks[0], (planes, in_planes, 3, 3), jnp.float32),
        "b1": 0.05 * jax.random.normal(ks[1], (planes,), jnp.float32),
        "g1": 1.0 + 0.1 * jax.random.normal(ks[2], (planes,), jnp.float32),
        "be1": 0.1 * jax.random.normal(ks[3], (planes,), jnp.float32),
        "w2": 0.1 * jax.random.normal(ks[4], (planes, planes, 3, 3), jnp.float32),
        "b2": 0.05 * jax.random.normal(ks[5], (planes,), jnp.float32),
        "g2": 1.0 + 0.1 * jax.random.normal(ks[6], (planes,), jnp.float32),
        "be2": 0.1 * jax.random.normal(ks[7], (planes,), jnp.float32),
    }
    if has_downsample:
        p.update({
            "wd": 0.1 * jax.random.normal(ks[8], (planes, in_planes, 1, 1), jnp.float32),
            "bd": 0.05 * jax.random.normal(ks[9], (planes,), jnp.float32),
            "gd": 1.0 + 0.1 * jax.random.normal(ks[10], (planes,), jnp.float32),
            "bed": 0.1 * jax.random.normal(ks[11], (planes,), jnp.float32),
        })
    return p


if __name__ == "__main__":
    key = jax.random.PRNGKey(0)
    k_x1, k_p1, k_x2, k_p2 = jax.random.split(key, 4)

    def bf16_round(a):
        # The kernel runs its matmuls in bf16; pre-round x / conv weights so the
        # f32 reference sees the same values and the check isolates kernel math.
        return a.astype(jnp.bfloat16).astype(jnp.float32)

    fwd = jax.jit(residual_block_pallas, static_argnames=("stride",))

    # Config A: downsample path, K-packed conv1 (stride=2, Cin=8 -> 9*Cin<=128)
    N, Cin, planes, H, W, stride = 2, 8, 16, 16, 16, 2
    x = bf16_round(jax.random.normal(k_x1, (N, Cin, H, W), jnp.float32))
    params = make_params(k_p1, Cin, planes, has_downsample=True)
    for k in ("w1", "w2", "wd"):
        params[k] = bf16_round(params[k])
    out = jax.block_until_ready(fwd(x, params, stride=stride))
    ref = residual_block_ref(x, params, stride=stride)
    assert out.shape == (N, planes, H // stride, W // stride)
    np.testing.assert_allclose(np.asarray(out), np.asarray(ref), rtol=2e-2, atol=2e-2)

    # Config B: identity skip, phases path (stride=1, Cin=planes=16)
    N2, C2, H2, W2 = 2, 16, 8, 8
    x2 = bf16_round(jax.random.normal(k_x2, (N2, C2, H2, W2), jnp.float32))
    params2 = make_params(k_p2, C2, C2, has_downsample=False)
    for k in ("w1", "w2"):
        params2[k] = bf16_round(params2[k])
    out2 = jax.block_until_ready(fwd(x2, params2, stride=1))
    ref2 = residual_block_ref(x2, params2, stride=1)
    assert out2.shape == (N2, C2, H2, W2)
    np.testing.assert_allclose(np.asarray(out2), np.asarray(ref2), rtol=2e-2, atol=2e-2)

    print("KERNEL_OK")
</pallas_src>

<mosaic_0001>
module attributes {stable_mosaic.version = 11 : i64} {
  func.func @_fused_residual_kernel(%arg0: i32, %arg1: memref<1x64x128xbf16, #tpu.memory_space<vmem>>, %arg2: memref<128x128xbf16, #tpu.memory_space<vmem>>, %arg3: memref<9x128x128xbf16, #tpu.memory_space<vmem>>, %arg4: memref<128x128xbf16, #tpu.memory_space<vmem>>, %arg5: memref<3x128xf32, #tpu.memory_space<vmem>>, %arg6: memref<3x128xf32, #tpu.memory_space<vmem>>, %arg7: memref<3x128xf32, #tpu.memory_space<vmem>>, %arg8: memref<128x16xf32, #tpu.memory_space<vmem>>, %arg9: memref<16x128xf32, #tpu.memory_space<vmem>>, %arg10: memref<1x64x128xf32, #tpu.memory_space<vmem>>, %arg11: memref<10x10x128xbf16, #tpu.memory_space<vmem>>, %arg12: memref<64x128xbf16, #tpu.memory_space<vmem>>) attributes {dimension_semantics = [#tpu.dimension_semantics<parallel>], iteration_bounds = array<i64: 2>, scalar_prefetch = 0 : i64, scratch_operands = 2 : i64, tpu.core_type = #tpu.core_type<tc>, window_params = [{transform_indices = @transform_0, window_bounds = array<i64: 1, 64, 128>}, {pipeline_mode = #tpu.pipeline_mode<synchronous>, transform_indices = @transform_1, window_bounds = array<i64: 128, 128>}, {pipeline_mode = #tpu.pipeline_mode<synchronous>, transform_indices = @transform_2, window_bounds = array<i64: 9, 128, 128>}, {pipeline_mode = #tpu.pipeline_mode<synchronous>, transform_indices = @transform_3, window_bounds = array<i64: 128, 128>}, {pipeline_mode = #tpu.pipeline_mode<synchronous>, transform_indices = @transform_4, window_bounds = array<i64: 3, 128>}, {pipeline_mode = #tpu.pipeline_mode<synchronous>, transform_indices = @transform_5, window_bounds = array<i64: 3, 128>}, {pipeline_mode = #tpu.pipeline_mode<synchronous>, transform_indices = @transform_6, window_bounds = array<i64: 3, 128>}, {pipeline_mode = #tpu.pipeline_mode<synchronous>, transform_indices = @transform_7, window_bounds = array<i64: 128, 16>}, {pipeline_mode = #tpu.pipeline_mode<synchronous>, transform_indices = @transform_8, window_bounds = array<i64: 16, 128>}, {transform_indices = @transform_9, window_bounds = array<i64: 1, 64, 128>}]} {
    %cst = arith.constant 0.000000e+00 : bf16
    %0 = vector.broadcast %cst : bf16 to vector<1x10x128xbf16>
    %c0 = arith.constant 0 : index
    %c0_0 = arith.constant 0 : index
    %c0_1 = arith.constant 0 : index
    %1 = vector.load %arg11[%c0, %c0_0, %c0_1] : memref<10x10x128xbf16, #tpu.memory_space<vmem>>, vector<1x10x128xbf16>
    tpu.vector_store %arg11[%c0, %c0_0, %c0_1], %0 {strides = array<i32>} : memref<10x10x128xbf16, #tpu.memory_space<vmem>>, vector<1x10x128xbf16>,
    %cst_2 = arith.constant 0.000000e+00 : bf16
    %2 = vector.broadcast %cst_2 : bf16 to vector<1x10x128xbf16>
    %c9 = arith.constant 9 : index
    %c0_3 = arith.constant 0 : index
    %c0_4 = arith.constant 0 : index
    %3 = vector.load %arg11[%c9, %c0_3, %c0_4] : memref<10x10x128xbf16, #tpu.memory_space<vmem>>, vector<1x10x128xbf16>
    tpu.vector_store %arg11[%c9, %c0_3, %c0_4], %2 {strides = array<i32>} : memref<10x10x128xbf16, #tpu.memory_space<vmem>>, vector<1x10x128xbf16>,
    %cst_5 = arith.constant 0.000000e+00 : bf16
    %4 = vector.broadcast %cst_5 : bf16 to vector<10x1x128xbf16>
    %c0_6 = arith.constant 0 : index
    %c0_7 = arith.constant 0 : index
    %c0_8 = arith.constant 0 : index
    %5 = vector.load %arg11[%c0_6, %c0_7, %c0_8] : memref<10x10x128xbf16, #tpu.memory_space<vmem>>, vector<10x1x128xbf16>
    tpu.vector_store %arg11[%c0_6, %c0_7, %c0_8], %4 {strides = array<i32>} : memref<10x10x128xbf16, #tpu.memory_space<vmem>>, vector<10x1x128xbf16>,
    %cst_9 = arith.constant 0.000000e+00 : bf16
    %6 = vector.broadcast %cst_9 : bf16 to vector<10x1x128xbf16>
    %c0_10 = arith.constant 0 : index
    %c9_11 = arith.constant 9 : index
    %c0_12 = arith.constant 0 : index
    %7 = vector.load %arg11[%c0_10, %c9_11, %c0_12] : memref<10x10x128xbf16, #tpu.memory_space<vmem>>, vector<10x1x128xbf16>
    tpu.vector_store %arg11[%c0_10, %c9_11, %c0_12], %6 {strides = array<i32>} : memref<10x10x128xbf16, #tpu.memory_space<vmem>>, vector<10x1x128xbf16>,
    %cst_13 = arith.constant 0.000000e+00 : f32
    %8 = vector.broadcast %cst_13 : f32 to vector<2x128xf32>
    %c0_i32 = arith.constant 0 : i32
    %c64_i32 = arith.constant 64 : i32
    %9 = arith.muli %c0_i32, %c64_i32 : i32
    %10 = tpu.assume_multiple %9, 8 : i32
    %c0_14 = arith.constant 0 : index
    %11 = arith.index_cast %10 : i32 to index
    %c0_15 = arith.constant 0 : index
    %12 = vector.load %arg1[%c0_14, %11, %c0_15] : memref<1x64x128xbf16, #tpu.memory_space<vmem>>, vector<1x64x128xbf16>
    %13 = vector.shape_cast %12 : vector<1x64x128xbf16> to vector<64x128xbf16>
    %c0_16 = arith.constant 0 : index
    %c0_17 = arith.constant 0 : index
    %14 = vector.load %arg2[%c0_16, %c0_17] : memref<128x128xbf16, #tpu.memory_space<vmem>>, vector<128x128xbf16>
    %cst_18 = arith.constant dense<0.000000e+00> : vector<64x128xf32>
    %15 = tpu.matmul %13, %14, %cst_18 {dimension_numbers = #tpu.dot_dimension_numbers<[1], [0], [0], [1], [0, 0, 1, 1], [], []>} : vector<64x128xbf16>, vector<128x128xbf16>, vector<64x128xf32> -> vector<64x128xf32>
    %c0_19 = arith.constant 0 : index
    %c0_20 = arith.constant 0 : index
    %16 = vector.load %arg5[%c0_19, %c0_20] : memref<3x128xf32, #tpu.memory_space<vmem>>, vector<1x128xf32>
    %17 = vector.broadcast %16 : vector<1x128xf32> to vector<64x128xf32>
    %18 = arith.addf %15, %17 : vector<64x128xf32>
    %19 = arith.truncf %18 : vector<64x128xf32> to vector<64x128xbf16>
    %c64_i32_21 = arith.constant 64 : i32
    %20 = arith.muli %c0_i32, %c64_i32_21 : i32
    %21 = tpu.assume_multiple %20, 8 : i32
    %22 = arith.index_cast %21 : i32 to index
    %c0_22 = arith.constant 0 : index
    %23 = vector.load %arg12[%22, %c0_22] : memref<64x128xbf16, #tpu.memory_space<vmem>>, vector<64x128xbf16>
    tpu.vector_store %arg12[%22, %c0_22], %19 {strides = array<i32>} : memref<64x128xbf16, #tpu.memory_space<vmem>>, vector<64x128xbf16>,
    %cst_23 = arith.constant dense<0.000000e+00> : vector<128xf32>
    %24 = vector.multi_reduction <add>, %18, %cst_23 [0] : vector<64x128xf32> to vector<128xf32>
    %25 = vector.shape_cast %24 : vector<128xf32> to vector<1x128xf32>
    %26 = arith.mulf %18, %18 : vector<64x128xf32>
    %cst_24 = arith.constant dense<0.000000e+00> : vector<128xf32>
    %27 = vector.multi_reduction <add>, %26, %cst_24 [0] : vector<64x128xf32> to vector<128xf32>
    %28 = vector.shape_cast %27 : vector<128xf32> to vector<1x128xf32>
    %29 = tpu.concatenate %25, %28 in 0 : vector<1x128xf32>, vector<1x128xf32> -> vector<2x128xf32>
    %30 = arith.addf %8, %29 : vector<2x128xf32>
    %c1_i32 = arith.constant 1 : i32
    %c0_25 = arith.constant 0 : index
    %c0_26 = arith.constant 0 : index
    %31 = vector.load %arg8[%c0_25, %c0_26] : memref<128x16xf32, #tpu.memory_space<vmem>>, vector<128x16xf32>
    %cst_27 = arith.constant dense<0.000000e+00> : vector<2x16xf32>
    %32 = tpu.matmul %30, %31, %cst_27 {dimension_numbers = #tpu.dot_dimension_numbers<[1], [0], [0], [1], [0, 0, 1, 1], [], []>} : vector<2x128xf32>, vector<128x16xf32>, vector<2x16xf32> -> vector<2x16xf32>
    %33 = vector.extract_strided_slice %32 {offsets = [0, 0], sizes = [1, 16], strides = [1, 1]} : vector<2x16xf32> to vector<1x16xf32>
    %cst_28 = arith.constant 0.001953125 : f32
    %34 = vector.broadcast %cst_28 : f32 to vector<1x16xf32>
    %35 = arith.mulf %33, %34 : vector<1x16xf32>
    %36 = vector.extract_strided_slice %32 {offsets = [1, 0], sizes = [1, 16], strides = [1, 1]} : vector<2x16xf32> to vector<1x16xf32>
    %cst_29 = arith.constant 0.001953125 : f32
    %37 = vector.broadcast %cst_29 : f32 to vector<1x16xf32>
    %38 = arith.mulf %36, %37 : vector<1x16xf32>
    %39 = arith.mulf %35, %35 : vector<1x16xf32>
    %40 = arith.subf %38, %39 : vector<1x16xf32>
    %cst_30 = arith.constant 9.99999974E-6 : f32
    %41 = vector.broadcast %cst_30 : f32 to vector<1x16xf32>
    %42 = arith.addf %40, %41 : vector<1x16xf32>
    %43 = math.rsqrt %42 : vector<1x16xf32>
    %44 = tpu.concatenate %35, %43 in 0 : vector<1x16xf32>, vector<1x16xf32> -> vector<2x16xf32>
    %c0_31 = arith.constant 0 : index
    %c0_32 = arith.constant 0 : index
    %45 = vector.load %arg9[%c0_31, %c0_32] : memref<16x128xf32, #tpu.memory_space<vmem>>, vector<16x128xf32>
    %cst_33 = arith.constant dense<0.000000e+00> : vector<2x128xf32>
    %46 = tpu.matmul %44, %45, %cst_33 {dimension_numbers = #tpu.dot_dimension_numbers<[1], [0], [0], [1], [0, 0, 1, 1], [], []>} : vector<2x16xf32>, vector<16x128xf32>, vector<2x128xf32> -> vector<2x128xf32>
    %47 = vector.extract_strided_slice %46 {offsets = [1, 0], sizes = [1, 128], strides = [1, 1]} : vector<2x128xf32> to vector<1x128xf32>
    %c1 = arith.constant 1 : index
    %c0_34 = arith.constant 0 : index
    %48 = vector.load %arg5[%c1, %c0_34] : memref<3x128xf32, #tpu.memory_space<vmem>>, vector<1x128xf32>
    %49 = arith.mulf %47, %48 : vector<1x128xf32>
    %c2 = arith.constant 2 : index
    %c0_35 = arith.constant 0 : index
    %50 = vector.load %arg5[%c2, %c0_35] : memref<3x128xf32, #tpu.memory_space<vmem>>, vector<1x128xf32>
    %51 = vector.extract_strided_slice %46 {offsets = [0, 0], sizes = [1, 128], strides = [1, 1]} : vector<2x128xf32> to vector<1x128xf32>
    %52 = arith.mulf %51, %49 : vector<1x128xf32>
    %53 = arith.subf %50, %52 : vector<1x128xf32>
    %c0_i32_36 = arith.constant 0 : i32
    %c64_i32_37 = arith.constant 64 : i32
    %54 = arith.muli %c0_i32_36, %c64_i32_37 : i32
    %55 = tpu.assume_multiple %54, 8 : i32
    %56 = arith.index_cast %55 : i32 to index
    %c0_38 = arith.constant 0 : index
    %57 = vector.load %arg12[%56, %c0_38] : memref<64x128xbf16, #tpu.memory_space<vmem>>, vector<64x128xbf16>
    %58 = arith.extf %57 : vector<64x128xbf16> to vector<64x128xf32>
    %59 = vector.broadcast %49 : vector<1x128xf32> to vector<64x128xf32>
    %60 = arith.mulf %58, %59 : vector<64x128xf32>
    %61 = vector.broadcast %53 : vector<1x128xf32> to vector<64x128xf32>
    %62 = arith.addf %60, %61 : vector<64x128xf32>
    %cst_39 = arith.constant 0.000000e+00 : f32
    %63 = vector.broadcast %cst_39 : f32 to vector<64x128xf32>
    %64 = arith.maximumf %62, %63 : vector<64x128xf32>
    %65 = vector.shape_cast %64 : vector<64x128xf32> to vector<8x8x128xf32>
    %66 = arith.truncf %65 : vector<8x8x128xf32> to vector<8x8x128xbf16>
    %c8_i32 = arith.constant 8 : i32
    %67 = arith.muli %c0_i32_36, %c8_i32 : i32
    %c1_i32_40 = arith.constant 1 : i32
    %68 = arith.addi %c1_i32_40, %67 : i32
    %69 = arith.index_cast %68 : i32 to index
    %c1_41 = arith.constant 1 : index
    %c0_42 = arith.constant 0 : index
    %70 = vector.load %arg11[%69, %c1_41, %c0_42] : memref<10x10x128xbf16, #tpu.memory_space<vmem>>, vector<8x8x128xbf16>
    tpu.vector_store %arg11[%69, %c1_41, %c0_42], %66 {strides = array<i32>} : memref<10x10x128xbf16, #tpu.memory_space<vmem>>, vector<8x8x128xbf16>,
    %c1_i32_43 = arith.constant 1 : i32
    %cst_44 = arith.constant 0.000000e+00 : f32
    %71 = vector.broadcast %cst_44 : f32 to vector<2x128xf32>
    %cst_45 = arith.constant 0.000000e+00 : f32
    %72 = vector.broadcast %cst_45 : f32 to vector<2x128xf32>
    %c0_i32_46 = arith.constant 0 : i32
    %c8_i32_47 = arith.constant 8 : i32
    %73 = arith.muli %c0_i32_46, %c8_i32_47 : i32
    %cst_48 = arith.constant 0.000000e+00 : f32
    %74 = vector.broadcast %cst_48 : f32 to vector<64x128xf32>
    %c0_i32_49 = arith.constant 0 : i32
    %75 = arith.addi %73, %c0_i32_49 : i32
    %76 = arith.index_cast %75 : i32 to index
    %c0_50 = arith.constant 0 : index
    %c0_51 = arith.constant 0 : index
    %77 = vector.load %arg11[%76, %c0_50, %c0_51] : memref<10x10x128xbf16, #tpu.memory_space<vmem>>, vector<8x8x128xbf16>
    %78 = vector.shape_cast %77 : vector<8x8x128xbf16> to vector<64x128xbf16>
    %c0_52 = arith.constant 0 : index
    %c0_53 = arith.constant 0 : index
    %c0_54 = arith.constant 0 : index
    %79 = vector.load %arg3[%c0_52, %c0_53, %c0_54] : memref<9x128x128xbf16, #tpu.memory_space<vmem>>, vector<1x128x128xbf16>
    %80 = vector.shape_cast %79 : vector<1x128x128xbf16> to vector<128x128xbf16>
    %cst_55 = arith.constant dense<0.000000e+00> : vector<64x128xf32>
    %81 = tpu.matmul %78, %80, %cst_55 {dimension_numbers = #tpu.dot_dimension_numbers<[1], [0], [0], [1], [0, 0, 1, 1], [], []>} : vector<64x128xbf16>, vector<128x128xbf16>, vector<64x128xf32> -> vector<64x128xf32>
    %82 = arith.addf %74, %81 : vector<64x128xf32>
    %c0_i32_56 = arith.constant 0 : i32
    %83 = arith.addi %73, %c0_i32_56 : i32
    %84 = arith.index_cast %83 : i32 to index
    %c1_57 = arith.constant 1 : index
    %c0_58 = arith.constant 0 : index
    %85 = vector.load %arg11[%84, %c1_57, %c0_58] : memref<10x10x128xbf16, #tpu.memory_space<vmem>>, vector<8x8x128xbf16>
    %86 = vector.shape_cast %85 : vector<8x8x128xbf16> to vector<64x128xbf16>
    %c1_59 = arith.constant 1 : index
    %c0_60 = arith.constant 0 : index
    %c0_61 = arith.constant 0 : index
    %87 = vector.load %arg3[%c1_59, %c0_60, %c0_61] : memref<9x128x128xbf16, #tpu.memory_space<vmem>>, vector<1x128x128xbf16>
    %88 = vector.shape_cast %87 : vector<1x128x128xbf16> to vector<128x128xbf16>
    %cst_62 = arith.constant dense<0.000000e+00> : vector<64x128xf32>
    %89 = tpu.matmul %86, %88, %cst_62 {dimension_numbers = #tpu.dot_dimension_numbers<[1], [0], [0], [1], [0, 0, 1, 1], [], []>} : vector<64x128xbf16>, vector<128x128xbf16>, vector<64x128xf32> -> vector<64x128xf32>
    %90 = arith.addf %82, %89 : vector<64x128xf32>
    %c0_i32_63 = arith.constant 0 : i32
    %91 = arith.addi %73, %c0_i32_63 : i32
    %92 = arith.index_cast %91 : i32 to index
    %c2_64 = arith.constant 2 : index
    %c0_65 = arith.constant 0 : index
    %93 = vector.load %arg11[%92, %c2_64, %c0_65] : memref<10x10x128xbf16, #tpu.memory_space<vmem>>, vector<8x8x128xbf16>
    %94 = vector.shape_cast %93 : vector<8x8x128xbf16> to vector<64x128xbf16>
    %c2_66 = arith.constant 2 : index
    %c0_67 = arith.constant 0 : index
    %c0_68 = arith.constant 0 : index
    %95 = vector.load %arg3[%c2_66, %c0_67, %c0_68] : memref<9x128x128xbf16, #tpu.memory_space<vmem>>, vector<1x128x128xbf16>
    %96 = vector.shape_cast %95 : vector<1x128x128xbf16> to vector<128x128xbf16>
    %cst_69 = arith.constant dense<0.000000e+00> : vector<64x128xf32>
    %97 = tpu.matmul %94, %96, %cst_69 {dimension_numbers = #tpu.dot_dimension_numbers<[1], [0], [0], [1], [0, 0, 1, 1], [], []>} : vector<64x128xbf16>, vector<128x128xbf16>, vector<64x128xf32> -> vector<64x128xf32>
    %98 = arith.addf %90, %97 : vector<64x128xf32>
    %c1_i32_70 = arith.constant 1 : i32
    %99 = arith.addi %73, %c1_i32_70 : i32
    %100 = arith.index_cast %99 : i32 to index
    %c0_71 = arith.constant 0 : index
    %c0_72 = arith.constant 0 : index
    %101 = vector.load %arg11[%100, %c0_71, %c0_72] : memref<10x10x128xbf16, #tpu.memory_space<vmem>>, vector<8x8x128xbf16>
    %102 = vector.shape_cast %101 : vector<8x8x128xbf16> to vector<64x128xbf16>
    %c3 = arith.constant 3 : index
    %c0_73 = arith.constant 0 : index
    %c0_74 = arith.constant 0 : index
    %103 = vector.load %arg3[%c3, %c0_73, %c0_74] : memref<9x128x128xbf16, #tpu.memory_space<vmem>>, vector<1x128x128xbf16>
    %104 = vector.shape_cast %103 : vector<1x128x128xbf16> to vector<128x128xbf16>
    %cst_75 = arith.constant dense<0.000000e+00> : vector<64x128xf32>
    %105 = tpu.matmul %102, %104, %cst_75 {dimension_numbers = #tpu.dot_dimension_numbers<[1], [0], [0], [1], [0, 0, 1, 1], [], []>} : vector<64x128xbf16>, vector<128x128xbf16>, vector<64x128xf32> -> vector<64x128xf32>
    %106 = arith.addf %98, %105 : vector<64x128xf32>
    %c1_i32_76 = arith.constant 1 : i32
    %107 = arith.addi %73, %c1_i32_76 : i32
    %108 = arith.index_cast %107 : i32 to index
    %c1_77 = arith.constant 1 : index
    %c0_78 = arith.constant 0 : index
    %109 = vector.load %arg11[%108, %c1_77, %c0_78] : memref<10x10x128xbf16, #tpu.memory_space<vmem>>, vector<8x8x128xbf16>
    %110 = vector.shape_cast %109 : vector<8x8x128xbf16> to vector<64x128xbf16>
    %c4 = arith.constant 4 : index
    %c0_79 = arith.constant 0 : index
    %c0_80 = arith.constant 0 : index
    %111 = vector.load %arg3[%c4, %c0_79, %c0_80] : memref<9x128x128xbf16, #tpu.memory_space<vmem>>, vector<1x128x128xbf16>
    %112 = vector.shape_cast %111 : vector<1x128x128xbf16> to vector<128x128xbf16>
    %cst_81 = arith.constant dense<0.000000e+00> : vector<64x128xf32>
    %113 = tpu.matmul %110, %112, %cst_81 {dimension_numbers = #tpu.dot_dimension_numbers<[1], [0], [0], [1], [0, 0, 1, 1], [], []>} : vector<64x128xbf16>, vector<128x128xbf16>, vector<64x128xf32> -> vector<64x128xf32>
    %114 = arith.addf %106, %113 : vector<64x128xf32>
    %c1_i32_82 = arith.constant 1 : i32
    %115 = arith.addi %73, %c1_i32_82 : i32
    %116 = arith.index_cast %115 : i32 to index
    %c2_83 = arith.constant 2 : index
    %c0_84 = arith.constant 0 : index
    %117 = vector.load %arg11[%116, %c2_83, %c0_84] : memref<10x10x128xbf16, #tpu.memory_space<vmem>>, vector<8x8x128xbf16>
    %118 = vector.shape_cast %117 : vector<8x8x128xbf16> to vector<64x128xbf16>
    %c5 = arith.constant 5 : index
    %c0_85 = arith.constant 0 : index
    %c0_86 = arith.constant 0 : index
    %119 = vector.load %arg3[%c5, %c0_85, %c0_86] : memref<9x128x128xbf16, #tpu.memory_space<vmem>>, vector<1x128x128xbf16>
    %120 = vector.shape_cast %119 : vector<1x128x128xbf16> to vector<128x128xbf16>
    %cst_87 = arith.constant dense<0.000000e+00> : vector<64x128xf32>
    %121 = tpu.matmul %118, %120, %cst_87 {dimension_numbers = #tpu.dot_dimension_numbers<[1], [0], [0], [1], [0, 0, 1, 1], [], []>} : vector<64x128xbf16>, vector<128x128xbf16>, vector<64x128xf32> -> vector<64x128xf32>
    %122 = arith.addf %114, %121 : vector<64x128xf32>
    %c2_i32 = arith.constant 2 : i32
    %123 = arith.addi %73, %c2_i32 : i32
    %124 = arith.index_cast %123 : i32 to index
    %c0_88 = arith.constant 0 : index
    %c0_89 = arith.constant 0 : index
    %125 = vector.load %arg11[%124, %c0_88, %c0_89] : memref<10x10x128xbf16, #tpu.memory_space<vmem>>, vector<8x8x128xbf16>
    %126 = vector.shape_cast %125 : vector<8x8x128xbf16> to vector<64x128xbf16>
    %c6 = arith.constant 6 : index
    %c0_90 = arith.constant 0 : index
    %c0_91 = arith.constant 0 : index
    %127 = vector.load %arg3[%c6, %c0_90, %c0_91] : memref<9x128x128xbf16, #tpu.memory_space<vmem>>, vector<1x128x128xbf16>
    %128 = vector.shape_cast %127 : vector<1x128x128xbf16> to vector<128x128xbf16>
    %cst_92 = arith.constant dense<0.000000e+00> : vector<64x128xf32>
    %129 = tpu.matmul %126, %128, %cst_92 {dimension_numbers = #tpu.dot_dimension_numbers<[1], [0], [0], [1], [0, 0, 1, 1], [], []>} : vector<64x128xbf16>, vector<128x128xbf16>, vector<64x128xf32> -> vector<64x128xf32>
    %130 = arith.addf %122, %129 : vector<64x128xf32>
    %c2_i32_93 = arith.constant 2 : i32
    %131 = arith.addi %73, %c2_i32_93 : i32
    %132 = arith.index_cast %131 : i32 to index
    %c1_94 = arith.constant 1 : index
    %c0_95 = arith.constant 0 : index
    %133 = vector.load %arg11[%132, %c1_94, %c0_95] : memref<10x10x128xbf16, #tpu.memory_space<vmem>>, vector<8x8x128xbf16>
    %134 = vector.shape_cast %133 : vector<8x8x128xbf16> to vector<64x128xbf16>
    %c7 = arith.constant 7 : index
    %c0_96 = arith.constant 0 : index
    %c0_97 = arith.constant 0 : index
    %135 = vector.load %arg3[%c7, %c0_96, %c0_97] : memref<9x128x128xbf16, #tpu.memory_space<vmem>>, vector<1x128x128xbf16>
    %136 = vector.shape_cast %135 : vector<1x128x128xbf16> to vector<128x128xbf16>
    %cst_98 = arith.constant dense<0.000000e+00> : vector<64x128xf32>
    %137 = tpu.matmul %134, %136, %cst_98 {dimension_numbers = #tpu.dot_dimension_numbers<[1], [0], [0], [1], [0, 0, 1, 1], [], []>} : vector<64x128xbf16>, vector<128x128xbf16>, vector<64x128xf32> -> vector<64x128xf32>
    %138 = arith.addf %130, %137 : vector<64x128xf32>
    %c2_i32_99 = arith.constant 2 : i32
    %139 = arith.addi %73, %c2_i32_99 : i32
    %140 = arith.index_cast %139 : i32 to index
    %c2_100 = arith.constant 2 : index
    %c0_101 = arith.constant 0 : index
    %141 = vector.load %arg11[%140, %c2_100, %c0_101] : memref<10x10x128xbf16, #tpu.memory_space<vmem>>, vector<8x8x128xbf16>
    %142 = vector.shape_cast %141 : vector<8x8x128xbf16> to vector<64x128xbf16>
    %c8 = arith.constant 8 : index
    %c0_102 = arith.constant 0 : index
    %c0_103 = arith.constant 0 : index
    %143 = vector.load %arg3[%c8, %c0_102, %c0_103] : memref<9x128x128xbf16, #tpu.memory_space<vmem>>, vector<1x128x128xbf16>
    %144 = vector.shape_cast %143 : vector<1x128x128xbf16> to vector<128x128xbf16>
    %cst_104 = arith.constant dense<0.000000e+00> : vector<64x128xf32>
    %145 = tpu.matmul %142, %144, %cst_104 {dimension_numbers = #tpu.dot_dimension_numbers<[1], [0], [0], [1], [0, 0, 1, 1], [], []>} : vector<64x128xbf16>, vector<128x128xbf16>, vector<64x128xf32> -> vector<64x128xf32>
    %146 = arith.addf %138, %145 : vector<64x128xf32>
    %c0_105 = arith.constant 0 : index
    %c0_106 = arith.constant 0 : index
    %147 = vector.load %arg6[%c0_105, %c0_106] : memref<3x128xf32, #tpu.memory_space<vmem>>, vector<1x128xf32>
    %148 = vector.broadcast %147 : vector<1x128xf32> to vector<64x128xf32>
    %149 = arith.addf %146, %148 : vector<64x128xf32>
    %150 = arith.truncf %149 : vector<64x128xf32> to vector<64x128xbf16>
    %c64_i32_107 = arith.constant 64 : i32
    %151 = arith.muli %c0_i32_46, %c64_i32_107 : i32
    %152 = tpu.assume_multiple %151, 8 : i32
    %153 = arith.index_cast %152 : i32 to index
    %c0_108 = arith.constant 0 : index
    %154 = vector.load %arg12[%153, %c0_108] : memref<64x128xbf16, #tpu.memory_space<vmem>>, vector<64x128xbf16>
    tpu.vector_store %arg12[%153, %c0_108], %150 {strides = array<i32>} : memref<64x128xbf16, #tpu.memory_space<vmem>>, vector<64x128xbf16>,
    %cst_109 = arith.constant dense<0.000000e+00> : vector<128xf32>
    %155 = vector.multi_reduction <add>, %149, %cst_109 [0] : vector<64x128xf32> to vector<128xf32>
    %156 = vector.shape_cast %155 : vector<128xf32> to vector<1x128xf32>
    %157 = arith.mulf %149, %149 : vector<64x128xf32>
    %cst_110 = arith.constant dense<0.000000e+00> : vector<128xf32>
    %158 = vector.multi_reduction <add>, %157, %cst_110 [0] : vector<64x128xf32> to vector<128xf32>
    %159 = vector.shape_cast %158 : vector<128xf32> to vector<1x128xf32>
    %160 = tpu.concatenate %156, %159 in 0 : vector<1x128xf32>, vector<1x128xf32> -> vector<2x128xf32>
    %161 = arith.addf %71, %160 : vector<2x128xf32>
    %c64_i32_111 = arith.constant 64 : i32
    %162 = arith.muli %c0_i32_46, %c64_i32_111 : i32
    %163 = tpu.assume_multiple %162, 8 : i32
    %c0_112 = arith.constant 0 : index
    %164 = arith.index_cast %163 : i32 to index
    %c0_113 = arith.constant 0 : index
    %165 = vector.load %arg1[%c0_112, %164, %c0_113] : memref<1x64x128xbf16, #tpu.memory_space<vmem>>, vector<1x64x128xbf16>
    %166 = vector.shape_cast %165 : vector<1x64x128xbf16> to vector<64x128xbf16>
    %c0_114 = arith.constant 0 : index
    %c0_115 = arith.constant 0 : index
    %167 = vector.load %arg4[%c0_114, %c0_115] : memref<128x128xbf16, #tpu.memory_space<vmem>>, vector<128x128xbf16>
    %cst_116 = arith.constant dense<0.000000e+00> : vector<64x128xf32>
    %168 = tpu.matmul %166, %167, %cst_116 {dimension_numbers = #tpu.dot_dimension_numbers<[1], [0], [0], [1], [0, 0, 1, 1], [], []>} : vector<64x128xbf16>, vector<128x128xbf16>, vector<64x128xf32> -> vector<64x128xf32>
    %c0_117 = arith.constant 0 : index
    %c0_118 = arith.constant 0 : index
    %169 = vector.load %arg7[%c0_117, %c0_118] : memref<3x128xf32, #tpu.memory_space<vmem>>, vector<1x128xf32>
    %170 = vector.broadcast %169 : vector<1x128xf32> to vector<64x128xf32>
    %171 = arith.addf %168, %170 : vector<64x128xf32>
    %cst_119 = arith.constant dense<0.000000e+00> : vector<128xf32>
    %172 = vector.multi_reduction <add>, %171, %cst_119 [0] : vector<64x128xf32> to vector<128xf32>
    %173 = vector.shape_cast %172 : vector<128xf32> to vector<1x128xf32>
    %174 = arith.mulf %171, %171 : vector<64x128xf32>
    %cst_120 = arith.constant dense<0.000000e+00> : vector<128xf32>
    %175 = vector.multi_reduction <add>, %174, %cst_120 [0] : vector<64x128xf32> to vector<128xf32>
    %176 = vector.shape_cast %175 : vector<128xf32> to vector<1x128xf32>
    %177 = tpu.concatenate %173, %176 in 0 : vector<1x128xf32>, vector<1x128xf32> -> vector<2x128xf32>
    %178 = arith.addf %72, %177 : vector<2x128xf32>
    %c1_i32_121 = arith.constant 1 : i32
    %c0_122 = arith.constant 0 : index
    %c0_123 = arith.constant 0 : index
    %179 = vector.load %arg8[%c0_122, %c0_123] : memref<128x16xf32, #tpu.memory_space<vmem>>, vector<128x16xf32>
    %cst_124 = arith.constant dense<0.000000e+00> : vector<2x16xf32>
    %180 = tpu.matmul %161, %179, %cst_124 {dimension_numbers = #tpu.dot_dimension_numbers<[1], [0], [0], [1], [0, 0, 1, 1], [], []>} : vector<2x128xf32>, vector<128x16xf32>, vector<2x16xf32> -> vector<2x16xf32>
    %181 = vector.extract_strided_slice %180 {offsets = [0, 0], sizes = [1, 16], strides = [1, 1]} : vector<2x16xf32> to vector<1x16xf32>
    %cst_125 = arith.constant 0.001953125 : f32
    %182 = vector.broadcast %cst_125 : f32 to vector<1x16xf32>
    %183 = arith.mulf %181, %182 : vector<1x16xf32>
    %184 = vector.extract_strided_slice %180 {offsets = [1, 0], sizes = [1, 16], strides = [1, 1]} : vector<2x16xf32> to vector<1x16xf32>
    %cst_126 = arith.constant 0.001953125 : f32
    %185 = vector.broadcast %cst_126 : f32 to vector<1x16xf32>
    %186 = arith.mulf %184, %185 : vector<1x16xf32>
    %187 = arith.mulf %183, %183 : vector<1x16xf32>
    %188 = arith.subf %186, %187 : vector<1x16xf32>
    %cst_127 = arith.constant 9.99999974E-6 : f32
    %189 = vector.broadcast %cst_127 : f32 to vector<1x16xf32>
    %190 = arith.addf %188, %189 : vector<1x16xf32>
    %191 = math.rsqrt %190 : vector<1x16xf32>
    %192 = tpu.concatenate %183, %191 in 0 : vector<1x16xf32>, vector<1x16xf32> -> vector<2x16xf32>
    %c0_128 = arith.constant 0 : index
    %c0_129 = arith.constant 0 : index
    %193 = vector.load %arg9[%c0_128, %c0_129] : memref<16x128xf32, #tpu.memory_space<vmem>>, vector<16x128xf32>
    %cst_130 = arith.constant dense<0.000000e+00> : vector<2x128xf32>
    %194 = tpu.matmul %192, %193, %cst_130 {dimension_numbers = #tpu.dot_dimension_numbers<[1], [0], [0], [1], [0, 0, 1, 1], [], []>} : vector<2x16xf32>, vector<16x128xf32>, vector<2x128xf32> -> vector<2x128xf32>
    %195 = vector.extract_strided_slice %194 {offsets = [1, 0], sizes = [1, 128], strides = [1, 1]} : vector<2x128xf32> to vector<1x128xf32>
    %c1_131 = arith.constant 1 : index
    %c0_132 = arith.constant 0 : index
    %196 = vector.load %arg6[%c1_131, %c0_132] : memref<3x128xf32, #tpu.memory_space<vmem>>, vector<1x128xf32>
    %197 = arith.mulf %195, %196 : vector<1x128xf32>
    %c2_133 = arith.constant 2 : index
    %c0_134 = arith.constant 0 : index
    %198 = vector.load %arg6[%c2_133, %c0_134] : memref<3x128xf32, #tpu.memory_space<vmem>>, vector<1x128xf32>
    %199 = vector.extract_strided_slice %194 {offsets = [0, 0], sizes = [1, 128], strides = [1, 1]} : vector<2x128xf32> to vector<1x128xf32>
    %200 = arith.mulf %199, %197 : vector<1x128xf32>
    %201 = arith.subf %198, %200 : vector<1x128xf32>
    %c0_135 = arith.constant 0 : index
    %c0_136 = arith.constant 0 : index
    %202 = vector.load %arg8[%c0_135, %c0_136] : memref<128x16xf32, #tpu.memory_space<vmem>>, vector<128x16xf32>
    %cst_137 = arith.constant dense<0.000000e+00> : vector<2x16xf32>
    %203 = tpu.matmul %178, %202, %cst_137 {dimension_numbers = #tpu.dot_dimension_numbers<[1], [0], [0], [1], [0, 0, 1, 1], [], []>} : vector<2x128xf32>, vector<128x16xf32>, vector<2x16xf32> -> vector<2x16xf32>
    %204 = vector.extract_strided_slice %203 {offsets = [0, 0], sizes = [1, 16], strides = [1, 1]} : vector<2x16xf32> to vector<1x16xf32>
    %cst_138 = arith.constant 0.001953125 : f32
    %205 = vector.broadcast %cst_138 : f32 to vector<1x16xf32>
    %206 = arith.mulf %204, %205 : vector<1x16xf32>
    %207 = vector.extract_strided_slice %203 {offsets = [1, 0], sizes = [1, 16], strides = [1, 1]} : vector<2x16xf32> to vector<1x16xf32>
    %cst_139 = arith.constant 0.001953125 : f32
    %208 = vector.broadcast %cst_139 : f32 to vector<1x16xf32>
    %209 = arith.mulf %207, %208 : vector<1x16xf32>
    %210 = arith.mulf %206, %206 : vector<1x16xf32>
    %211 = arith.subf %209, %210 : vector<1x16xf32>
    %cst_140 = arith.constant 9.99999974E-6 : f32
    %212 = vector.broadcast %cst_140 : f32 to vector<1x16xf32>
    %213 = arith.addf %211, %212 : vector<1x16xf32>
    %214 = math.rsqrt %213 : vector<1x16xf32>
    %215 = tpu.concatenate %206, %214 in 0 : vector<1x16xf32>, vector<1x16xf32> -> vector<2x16xf32>
    %c0_141 = arith.constant 0 : index
    %c0_142 = arith.constant 0 : index
    %216 = vector.load %arg9[%c0_141, %c0_142] : memref<16x128xf32, #tpu.memory_space<vmem>>, vector<16x128xf32>
    %cst_143 = arith.constant dense<0.000000e+00> : vector<2x128xf32>
    %217 = tpu.matmul %215, %216, %cst_143 {dimension_numbers = #tpu.dot_dimension_numbers<[1], [0], [0], [1], [0, 0, 1, 1], [], []>} : vector<2x16xf32>, vector<16x128xf32>, vector<2x128xf32> -> vector<2x128xf32>
    %218 = vector.extract_strided_slice %217 {offsets = [1, 0], sizes = [1, 128], strides = [1, 1]} : vector<2x128xf32> to vector<1x128xf32>
    %c1_144 = arith.constant 1 : index
    %c0_145 = arith.constant 0 : index
    %219 = vector.load %arg7[%c1_144, %c0_145] : memref<3x128xf32, #tpu.memory_space<vmem>>, vector<1x128xf32>
    %220 = arith.mulf %218, %219 : vector<1x128xf32>
    %c2_146 = arith.constant 2 : index
    %c0_147 = arith.constant 0 : index
    %221 = vector.load %arg7[%c2_146, %c0_147] : memref<3x128xf32, #tpu.memory_space<vmem>>, vector<1x128xf32>
    %222 = vector.extract_strided_slice %217 {offsets = [0, 0], sizes = [1, 128], strides = [1, 1]} : vector<2x128xf32> to vector<1x128xf32>
    %223 = arith.mulf %222, %220 : vector<1x128xf32>
    %224 = arith.subf %221, %223 : vector<1x128xf32>
    %c0_i32_148 = arith.constant 0 : i32
    %c64_i32_149 = arith.constant 64 : i32
    %225 = arith.muli %c0_i32_148, %c64_i32_149 : i32
    %226 = tpu.assume_multiple %225, 8 : i32
    %227 = arith.index_cast %226 : i32 to index
    %c0_150 = arith.constant 0 : index
    %228 = vector.load %arg12[%227, %c0_150] : memref<64x128xbf16, #tpu.memory_space<vmem>>, vector<64x128xbf16>
    %229 = arith.extf %228 : vector<64x128xbf16> to vector<64x128xf32>
    %230 = vector.broadcast %197 : vector<1x128xf32> to vector<64x128xf32>
    %231 = arith.mulf %229, %230 : vector<64x128xf32>
    %232 = vector.broadcast %201 : vector<1x128xf32> to vector<64x128xf32>
    %233 = arith.addf %231, %232 : vector<64x128xf32>
    %cst_151 = arith.constant 0.000000e+00 : f32
    %234 = vector.broadcast %cst_151 : f32 to vector<64x128xf32>
    %235 = arith.maximumf %233, %234 : vector<64x128xf32>
    %c64_i32_152 = arith.constant 64 : i32
    %236 = arith.muli %c0_i32_148, %c64_i32_152 : i32
    %237 = tpu.assume_multiple %236, 8 : i32
    %c0_153 = arith.constant 0 : index
    %238 = arith.index_cast %237 : i32 to index
    %c0_154 = arith.constant 0 : index
    %239 = vector.load %arg1[%c0_153, %238, %c0_154] : memref<1x64x128xbf16, #tpu.memory_space<vmem>>, vector<1x64x128xbf16>
    %240 = vector.shape_cast %239 : vector<1x64x128xbf16> to vector<64x128xbf16>
    %c0_155 = arith.constant 0 : index
    %c0_156 = arith.constant 0 : index
    %241 = vector.load %arg4[%c0_155, %c0_156] : memref<128x128xbf16, #tpu.memory_space<vmem>>, vector<128x128xbf16>
    %cst_157 = arith.constant dense<0.000000e+00> : vector<64x128xf32>
    %242 = tpu.matmul %240, %241, %cst_157 {dimension_numbers = #tpu.dot_dimension_numbers<[1], [0], [0], [1], [0, 0, 1, 1], [], []>} : vector<64x128xbf16>, vector<128x128xbf16>, vector<64x128xf32> -> vector<64x128xf32>
    %c0_158 = arith.constant 0 : index
    %c0_159 = arith.constant 0 : index
    %243 = vector.load %arg7[%c0_158, %c0_159] : memref<3x128xf32, #tpu.memory_space<vmem>>, vector<1x128xf32>
    %244 = vector.broadcast %243 : vector<1x128xf32> to vector<64x128xf32>
    %245 = arith.addf %242, %244 : vector<64x128xf32>
    %246 = vector.broadcast %220 : vector<1x128xf32> to vector<64x128xf32>
    %247 = arith.mulf %245, %246 : vector<64x128xf32>
    %248 = vector.broadcast %224 : vector<1x128xf32> to vector<64x128xf32>
    %249 = arith.addf %247, %248 : vector<64x128xf32>
    %250 = arith.addf %249, %235 : vector<64x128xf32>
    %cst_160 = arith.constant 0.000000e+00 : f32
    %251 = vector.broadcast %cst_160 : f32 to vector<64x128xf32>
    %252 = arith.maximumf %250, %251 : vector<64x128xf32>
    %c0_161 = arith.constant 0 : index
    %253 = arith.index_cast %226 : i32 to index
    %c0_162 = arith.constant 0 : index
    %254 = vector.load %arg10[%c0_161, %253, %c0_162] : memref<1x64x128xf32, #tpu.memory_space<vmem>>, vector<1x64x128xf32>
    %255 = vector.shape_cast %254 : vector<1x64x128xf32> to vector<64x128xf32>
    %256 = vector.shape_cast %252 : vector<64x128xf32> to vector<1x64x128xf32>
    tpu.vector_store %arg10[%c0_161, %253, %c0_162], %256 {strides = array<i32>} : memref<1x64x128xf32, #tpu.memory_space<vmem>>, vector<1x64x128xf32>,
    %c1_i32_163 = arith.constant 1 : i32
    return
  }
  func.func @transform_0(%arg0: i32) -> (i32, i32, i32) {
    %c0_i32 = arith.constant 0 : i32
    %c0_i32_0 = arith.constant 0 : i32
    %c0_i32_1 = arith.constant 0 : i32
    return %arg0, %c0_i32, %c0_i32_0 : i32, i32, i32
  }
  func.func @transform_1(%arg0: i32) -> (i32, i32) {
    %c0_i32 = arith.constant 0 : i32
    %c0_i32_0 = arith.constant 0 : i32
    %c0_i32_1 = arith.constant 0 : i32
    return %c0_i32, %c0_i32_0 : i32, i32
  }
  func.func @transform_2(%arg0: i32) -> (i32, i32, i32) {
    %c0_i32 = arith.constant 0 : i32
    %c0_i32_0 = arith.constant 0 : i32
    %c0_i32_1 = arith.constant 0 : i32
    %c0_i32_2 = arith.constant 0 : i32
    return %c0_i32, %c0_i32_0, %c0_i32_1 : i32, i32, i32
  }
  func.func @transform_3(%arg0: i32) -> (i32, i32) {
    %c0_i32 = arith.constant 0 : i32
    %c0_i32_0 = arith.constant 0 : i32
    %c0_i32_1 = arith.constant 0 : i32
    return %c0_i32, %c0_i32_0 : i32, i32
  }
  func.func @transform_4(%arg0: i32) -> (i32, i32) {
    %c0_i32 = arith.constant 0 : i32
    %c0_i32_0 = arith.constant 0 : i32
    %c0_i32_1 = arith.constant 0 : i32
    return %c0_i32, %c0_i32_0 : i32, i32
  }
  func.func @transform_5(%arg0: i32) -> (i32, i32) {
    %c0_i32 = arith.constant 0 : i32
    %c0_i32_0 = arith.constant 0 : i32
    %c0_i32_1 = arith.constant 0 : i32
    return %c0_i32, %c0_i32_0 : i32, i32
  }
  func.func @transform_6(%arg0: i32) -> (i32, i32) {
    %c0_i32 = arith.constant 0 : i32
    %c0_i32_0 = arith.constant 0 : i32
    %c0_i32_1 = arith.constant 0 : i32
    return %c0_i32, %c0_i32_0 : i32, i32
  }
  func.func @transform_7(%arg0: i32) -> (i32, i32) {
    %c0_i32 = arith.constant 0 : i32
    %c0_i32_0 = arith.constant 0 : i32
    %c0_i32_1 = arith.constant 0 : i32
    return %c0_i32, %c0_i32_0 : i32, i32
  }
  func.func @transform_8(%arg0: i32) -> (i32, i32) {
    %c0_i32 = arith.constant 0 : i32
    %c0_i32_0 = arith.constant 0 : i32
    %c0_i32_1 = arith.constant 0 : i32
    return %c0_i32, %c0_i32_0 : i32, i32
  }
  func.func @transform_9(%arg0: i32) -> (i32, i32, i32) {
    %c0_i32 = arith.constant 0 : i32
    %c0_i32_0 = arith.constant 0 : i32
    %c0_i32_1 = arith.constant 0 : i32
    return %arg0, %c0_i32, %c0_i32_0 : i32, i32, i32
  }
}

</mosaic_0001>

<bundles_post_ra>
// kernel: residual_block_pallas.1
= control target key start
LH: loop header
LB: loop body
LE: loop exit
PB: predicated region body
PF: predicated region fallthrough
CT: control target
= control target key end

     0   :  { %s3895_s30 = smov 0   ;;  %s4841_s0 = inlined_call_operand.vmem [shape: bf16[2,64,128], index: 0, kind: input, shape index: {}]   ;;  %s4842_s1 = inlined_call_operand.vmem [shape: bf16[128,128], index: 1, kind: input, shape index: {}]   ;;  %s4843_s2 = inlined_call_operand.vmem [shape: bf16[9,128,128], index: 2, kind: input, shape index: {}]   ;;  %s4844_s3 = inlined_call_operand.vmem [shape: bf16[128,128], index: 3, kind: input, shape index: {}]   ;;  %s4845_s4 = inlined_call_operand.vmem [shape: f32[3,128], index: 4, kind: input, shape index: {}]   ;;  %s4846_s5 = inlined_call_operand.vmem [shape: f32[3,128], index: 5, kind: input, shape index: {}]   ;;  %s4847_s6 = inlined_call_operand.vmem [shape: f32[3,128], index: 6, kind: input, shape index: {}]   ;;  %s4848_s7 = inlined_call_operand.vmem [shape: f32[128,16], index: 7, kind: input, shape index: {}]   ;;  %s4849_s8 = inlined_call_operand.vmem [shape: f32[16,128], index: 8, kind: input, shape index: {}]   ;;  %s4850_s9 = inlined_call_operand.vmem [shape: f32[2,64,128], index: 9, kind: output, shape index: {}]  }
   0x1 LB: > { %s3026_s10 = sadd.s32 4294967295, %s3842_s30   ;;  %p3030_p0 = scmp.ge.s32.totalorder %s3842_s30, 1  ;;  %s3842_s30 = sphi %s3895_s30, %s19_s30  }
   0x2   : > { %p287_p1 = scmp.lt.s32.totalorder %s3842_s30, 3 }
   0x4   : > { %p288_p2 = pnand %p3030_p0, %p287_p1 }
   0x5   : > { %p323_p3 = scmp.lt.s32.totalorder (!%p288_p2), %s3026_s10, 1 }
   0x6   : > { %291 = sbr.rel (%p288_p2) target bundleno = 1229 (0x4cd), region = 56 }
   0xb   : > { %v3637_v0 = vld [vmem:[%s4842_s1 + $0x38] sm:$0xff]  ;;  %v3636_v1 = vld [vmem:[%s4842_s1 + $0x30] sm:$0xff]  ;;  %v3635_v2 = vld [vmem:[%s4842_s1 + $0x28] sm:$0xff]  ;;  %s4862_s10 = smov (!%p323_p3, %s3026_s10), 1  ;;  %vm339_vm0 = vcmask 1040384   ;;  %vm640_vm4 = vcmask 130048  }
   0xc   : > { %502 = vmatpush.bf16.msra.mxu0 %v3637_v0  ;;  %v3634_v3 = vld [vmem:[%s4842_s1 + $0x20] sm:$0xff]  ;;  %v3633_v4 = vld [vmem:[%s4842_s1 + $0x18] sm:$0xff]  ;;  %v3632_v5 = vld [vmem:[%s4842_s1 + $0x10] sm:$0xff]  ;;  %s3624_s25 = sshll.u32 %s4862_s10, 5  ;;  %vm340_vm5 = vsmask.f32 256 }
   0xd   : > { %v3631_v6 = vld [vmem:[%s4842_s1 + $0x8] sm:$0xff]  ;;  %v3630_v7 = vld [vmem:[%s4842_s1] sm:$0xff]  ;;  %s3933_s11 = scalar_lea.vmem %s4841_s0, %s3624_s25  ;;  %v599_v18 = vld [vmem:[%s4848_s7 + $0x78] sm:$0xff]  ;;  %vm372_vm7 = vsmask.f32 7938  ;;  %vm806_vm9 = vcmask 1043456  }
   0xe   : > { %v3626_v8 = vld [vmem:[%s3933_s11] sm:$0xff]  ;;  %v3627_v9 = vld [vmem:[%s3933_s11 + $0x8] sm:$0xff]  ;;  %v3628_v10 = vld [vmem:[%s3933_s11 + $0x10] sm:$0xff]  ;;  %600 = vmatpush.msra.mxu1 %v599_v18  ;;  %vm1238_vm11 = vcmask 1042432   ;;  %vm1239_vm12 = vcmask 1046532   ;;  %s3625_s25 = sshll.u32 %s4862_s10, 6 }
   0xf   : > { %v3629_v11 = vld [vmem:[%s3933_s11 + $0x18] sm:$0xff]  ;;  %v3942_v13 = vld [vmem:[%s4845_s4] ss:$0 sm:$0xff]  ;;  %v598_v19 = vld [vmem:[%s4848_s7 + $0x70] sm:$0xff]  ;;  %vm888_vm13 = vsmask.f32 3328  ;;  %s332_s28 = scalar_lea.vmem %s4850_s9, %s3625_s25 }
  0x10   : > { %503 = vmatpush.bf16.msra.mxu0 %v3636_v1  ;;  %601 = vmatpush.msra.mxu1 %v598_v19  ;;  %v597_v21 = vld [vmem:[%s4848_s7 + $0x68] sm:$0xff]  ;;  %v596_v22 = vld [vmem:[%s4848_s7 + $0x60] sm:$0xff]  ;;  %v595_v23 = vld [vmem:[%s4848_s7 + $0x58] sm:$0xff]  ;;  %vm889_vm15 = vsmask.f32 7440 }
  0x11   : > { %v594_v24 = vld [vmem:[%s4848_s7 + $0x50] sm:$0xff]  ;;  %v593_v26 = vld [vmem:[%s4848_s7 + $0x48] sm:$0xff]  ;;  %v592_v29 = vld [vmem:[%s4848_s7 + $0x40] sm:$0xff] }
  0x12   : > { %602 = vmatpush.msra.mxu1 %v597_v21  ;;  %v591_v31 = vld [vmem:[%s4848_s7 + $0x38] sm:$0xff]  ;;  %v590_v32 = vld [vmem:[%s4848_s7 + $0x30] sm:$0xff]  ;;  %v589_v33 = vld [vmem:[%s4848_s7 + $0x28] sm:$0xff] }
  0x13   : > { %v588_v35 = vld [vmem:[%s4848_s7 + $0x20] sm:$0xff]  ;;  %v587_v36 = vld [vmem:[%s4848_s7 + $0x18] sm:$0xff]  ;;  %v586_v37 = vld [vmem:[%s4848_s7 + $0x10] sm:$0xff] }
  0x14   : > { %504 = vmatpush.bf16.msra.mxu0 %v3635_v2  ;;  %603 = vmatpush.msra.mxu1 %v596_v22  ;;  %v585_v38 = vld [vmem:[%s4848_s7 + $0x8] sm:$0xff]  ;;  %v584_v40 = vld [vmem:[%s4848_s7] sm:$0xff]  ;;  %vm4042_vm6 = vmand %vm339_vm0, %vm340_vm5 }
  0x15   : > { %v639_v21 = vld [vmem:[%s4849_s8 + $0x8] sm:$0xff]  ;;  %v638_v22 = vld [vmem:[%s4849_s8] sm:$0xff]  ;;  %vm4062_vm8 = vmand %vm339_vm0, %vm372_vm7 }
  0x16   : > { %604 = vmatpush.msra.mxu1 %v595_v23  ;;  %658 = vmatpush.msra.mxu2 %v639_v21  ;;  %vm4187_vm10 = vmand %vm806_vm9, %vm372_vm7 }
  0x17   : > { %vm4218_vm14 = vmor %vm1238_vm11, %vm1239_vm12 }
  0x18   : > { %505 = vmatpush.bf16.msra.mxu0 %v3634_v3  ;;  %605 = vmatpush.msra.mxu1 %v594_v24 }
  0x19   : > { %659 = vmatpush.msra.mxu2 %v638_v22 }
  0x1a   : > { %606 = vmatpush.msra.mxu1 %v593_v26 }
  0x1c   : > { %506 = vmatpush.bf16.msra.mxu0 %v3633_v4  ;;  %607 = vmatpush.msra.mxu1 %v592_v29 }
  0x1e   : > { %608 = vmatpush.msra.mxu1 %v591_v31 }
  0x20   : > { %507 = vmatpush.bf16.msra.mxu0 %v3632_v5  ;;  %609 = vmatpush.msra.mxu1 %v590_v32 }
  0x22   : > { %610 = vmatpush.msra.mxu1 %v589_v33 }
  0x24   : > { %508 = vmatpush.bf16.msra.mxu0 %v3631_v6  ;;  %611 = vmatpush.msra.mxu1 %v588_v35 }
  0x26   : > { %612 = vmatpush.msra.mxu1 %v587_v36 }
  0x28   : > { %509 = vmatpush.bf16.msra.mxu0 %v3630_v7  ;;  %613 = vmatpush.msra.mxu1 %v586_v37 }
  0x2a   : > { %614 = vmatpush.msra.mxu1 %v585_v38  ;;  %v3649_v38 = vld [vmem:[%s4843_s2 + $0x38] sm:$0xff] }
  0x2b   : > { %510 = vmatmul.bf16.vlgmr.msra.gmra.mxu0 %v3626_v8  ;;  %1185 = vmatpush.bf16.msrb.mxu2 %v3649_v38 }
  0x2c   : > { %615 = vmatpush.msra.mxu1 %v584_v40  ;;  %v3648_v40 = vld [vmem:[%s4843_s2 + $0x30] sm:$0xff] }
  0x2f   : > { %1186 = vmatpush.bf16.msrb.mxu2 %v3648_v40 }
  0x3b   : > { %515 = vmatmul.bf16.gmra.mxu0 %v3627_v9 }
  0x4b   : > { %520 = vmatmul.bf16.gmra.mxu0 %v3628_v10 }
  0x5b   : > { %525 = vmatmul.bf16.gmra.mxu0 %v3629_v11 }
  0xa8   : > { %v511_v12 = vpop.f32.mrf.mxu0 }
  0xa9   : > { %v512_v15 = vadd.f32 %v3942_v13, %v511_v12 }
  0xab   : > { %v560_v45 = vmul.f32 %v512_v15, %v512_v15 }
  0xb0   : > { %v513_v14 = vpop.f32.mrf.mxu0 }
  0xb1   : > { %v514_v16 = vadd.f32 %v3942_v13, %v513_v14 }
  0xb3   : > { %v3946_v17 = vpack.c.bf16 %v514_v16, %v512_v15  ;;  %v561_v44 = vmul.f32 %v514_v16, %v514_v16  ;;  %v547_v46 = vadd.f32 %v514_v16, %v512_v15 }
  0xb5   : > { %v568_v49 = vadd.f32 %v561_v44, %v560_v45  ;;  %v3647_v44 = vld [vmem:[%s4843_s2 + $0x28] sm:$0xff]  ;;  %v3757_v40 = vunpack.c.h.bf16 %v3946_v17 }
  0xb6   : > { %v3675_v45 = vld [vmem:[%s4843_s2 + $0xe8] sm:$0xff]  ;;  %1187 = vmatpush.bf16.msrb.mxu2 %v3647_v44 }
  0xb8   : > { %v516_v20 = vpop.f32.mrf.mxu0 }
  0xb9   : > { %v517_v27 = vadd.f32 %v3942_v13, %v516_v20 }
  0xbb   : > { %v562_v47 = vmul.f32 %v517_v27, %v517_v27  ;;  %v548_v50 = vadd.f32 %v547_v46, %v517_v27  ;;  %v3664_v46 = vld [vmem:[%s4843_s2 + $0xb0] sm:$0xff] }
  0xbd   : > { %v569_v52 = vadd.f32 %v568_v49, %v562_v47  ;;  %v3646_v49 = vld [vmem:[%s4843_s2 + $0x20] sm:$0xff]  ;;  %v3716_v47 = vld [vmem:[%s4843_s2 + $0x210] sm:$0xff] }
  0xbe   : > { %1188 = vmatpush.bf16.msrb.mxu2 %v3646_v49 }
  0xc0   : > { %v518_v25 = vpop.f32.mrf.mxu0 }
  0xc1   : > { %v519_v28 = vadd.f32 %v3942_v13, %v518_v25 }
  0xc3   : > { %v3974_v30 = vpack.c.bf16 %v519_v28, %v517_v27  ;;  %v563_v51 = vmul.f32 %v519_v28, %v519_v28  ;;  %v549_v53 = vadd.f32 %v548_v50, %v519_v28  ;;  %v3674_v50 = vld [vmem:[%s4843_s2 + $0xe0] sm:$0xff] }
  0xc5   : > { %v570_v56 = vadd.f32 %v569_v52, %v563_v51  ;;  %v345_v51 = vld [vmem:[#allocation2 + $0x8] sm:$0x1] }
  0xc6   : > { %v3663_v52 = vld [vmem:[%s4843_s2 + $0xa8] sm:$0xff] }
  0xc8   : > { %v521_v34 = vpop.f32.mrf.mxu0 }
  0xc9   : > { %v522_v41 = vadd.f32 %v3942_v13, %v521_v34 }
  0xcb   : > { %v564_v54 = vmul.f32 %v522_v41, %v522_v41  ;;  %v550_v57 = vadd.f32 %v549_v53, %v522_v41  ;;  %v346_v53 = vsel %vm4042_vm6, 0, %v345_v51 }
  0xcc   : > { %347 = vst [vmem:[#allocation2 + $0x8] sm:$0x1] %v346_v53 }
  0xcd   : > { %v571_v59 = vadd.f32 %v570_v56, %v564_v54  ;;  %v348_v54 = vld [vmem:[#allocation2 + $0x10] sm:$0x1]  ;;  %v3844_v56 = vmov 0  }
  0xce   : > { %334 = vst [vmem:[#allocation2] sm:$0xf] %v3844_v56 }
  0xcf   : > { %335 = vst [vmem:[#allocation2 + $0x4] sm:$0x1] %v3844_v56 }
  0xd0   : > { %v523_v39 = vpop.f32.mrf.mxu0  ;;  %337 = vst [vmem:[#allocation2 + $0x48] sm:$0xf] %v3844_v56 }
  0xd1   : > { %v524_v42 = vadd.f32 %v3942_v13, %v523_v39  ;;  %v3677_v39 = vld [vmem:[%s4843_s2 + $0xf8] sm:$0xff]  ;;  %338 = vst [vmem:[#allocation2 + $0x4c] sm:$0x1] %v3844_v56 }
  0xd2   : > { %1488 = vmatpush.bf16.msrb.mxu0 %v3677_v39  ;;  %v3756_v39 = vunpack.c.l.bf16 %v3946_v17 }
  0xd3   : > { %v4002_v43 = vpack.c.bf16 %v524_v42, %v522_v41  ;;  %v565_v58 = vmul.f32 %v524_v42, %v524_v42  ;;  %v551_v60 = vadd.f32 %v550_v57, %v524_v42  ;;  %v3676_v41 = vld [vmem:[%s4843_s2 + $0xf0] sm:$0xff]  ;;  %v3665_v42 = vld [vmem:[%s4843_s2 + $0xb8] sm:$0xff]  ;;  %v377_v57 = vld [vmem:[#allocation2 + $0xc] sm:$0x1] }
  0xd4   : > { %1354 = vmatpush.bf16.msrb.mxu1 %v3665_v42  ;;  %v3761_v42 = vunpack.c.h.bf16 %v3974_v30 }
  0xd5   : > { %v572_v63 = vadd.f32 %v571_v59, %v565_v58  ;;  %v3656_v58 = vld [vmem:[%s4843_s2 + $0x70] sm:$0xff]  ;;  %v351_v59 = vld [vmem:[#allocation2 + $0x18] sm:$0x1]  ;;  %v342_v21 = vld [vmem:[#allocation2] sm:$0x1]  ;;  %v3764_v49 = vunpack.c.l.bf16 %v4002_v43 }
  0xd6   : > { %1489 = vmatpush.bf16.msrb.mxu0 %v3676_v41  ;;  %v374_v22 = vld [vmem:[#allocation2 + $0x4] sm:$0x1]  ;;  %v3760_v41 = vunpack.c.l.bf16 %v3974_v30  ;;  %v3651_v30 = vld [vmem:[%s4843_s2 + $0x48] sm:$0xff] }
  0xd8   : > { %v526_v48 = vpop.f32.mrf.mxu0  ;;  %1355 = vmatpush.bf16.msrb.mxu1 %v3664_v46 }
  0xd9   : > { %v527_v55 = vadd.f32 %v3942_v13, %v526_v48  ;;  %v3657_v48 = vld [vmem:[%s4843_s2 + $0x78] sm:$0xff] }
  0xda   : > { %1490 = vmatpush.bf16.msrb.mxu0 %v3675_v45  ;;  %1084 = vmatpush.bf16.msra.mxu3 %v3657_v48  ;;  %v3658_v45 = vld [vmem:[%s4843_s2 + $0x80] sm:$0xff] }
  0xdb   : > { %v566_v61 = vmul.f32 %v527_v55, %v527_v55  ;;  %v552_v0 = vadd.f32 %v551_v60, %v527_v55  ;;  %v3645_v60 = vld [vmem:[%s4843_s2 + $0x18] sm:$0xff]  ;;  %v386_v48 = vld [vmem:[#allocation2 + $0x24] sm:$0x1] }
  0xdc   : > { %1356 = vmatpush.bf16.msrb.mxu1 %v3663_v52  ;;  %1189 = vmatpush.bf16.msrb.mxu2 %v3645_v60 }
  0xdd   : > { %v573_v2 = vadd.f32 %v572_v63, %v566_v61  ;;  %v3673_v61 = vld [vmem:[%s4843_s2 + $0xd8] sm:$0xff]  ;;  %v664_v63 = vld [vmem:[%s4845_s4 + $0x1] sm:$0x1] }
  0xde   : > { %1491 = vmatpush.bf16.msrb.mxu0 %v3674_v50  ;;  %1085 = vmatpush.bf16.msra.mxu3 %v3656_v58  ;;  %v3765_v50 = vunpack.c.h.bf16 %v4002_v43 }
  0xe0   : > { %v528_v62 = vpop.f32.mrf.mxu0 }
  0xe1   : > { %v529_v1 = vadd.f32 %v3942_v13, %v528_v62  ;;  %v349_v62 = vsel %vm4042_vm6, 0, %v348_v54 }
  0xe2   : > { %1492 = vmatpush.bf16.msrb.mxu0 %v3673_v61  ;;  %350 = vst [vmem:[#allocation2 + $0x10] sm:$0x1] %v349_v62 }
  0xe3   : > { %v4006_v3 = vpack.c.bf16 %v529_v1, %v527_v55  ;;  %v553_v4 = vadd.f32 %v552_v0, %v529_v1  ;;  %v567_v5 = vmul.f32 %v529_v1, %v529_v1  ;;  %v3662_v0 = vld [vmem:[%s4843_s2 + $0xa0] sm:$0xff]  ;;  %v378_v1 = vsel %vm4062_vm8, 0, %v377_v57 }
  0xe4   : > { %1357 = vmatpush.bf16.msrb.mxu1 %v3662_v0  ;;  %379 = vst [vmem:[#allocation2 + $0xc] sm:$0x1] %v378_v1  ;;  %v387_v57 = vsel %vm4062_vm8, 0, %v386_v48  ;;  %v3650_v0 = vld [vmem:[%s4843_s2 + $0x40] sm:$0xff] }
  0xe5   : > { %v554_v6 = vrot.slane %v553_v4, 4  ;;  %v574_v7 = vadd.f32 %v573_v2, %v567_v5  ;;  %v354_v2 = vld [vmem:[#allocation2 + $0x20] sm:$0x1]  ;;  %v380_v5 = vld [vmem:[#allocation2 + $0x14] sm:$0x1] }
  0xe6   : > { %388 = vst [vmem:[#allocation2 + $0x24] sm:$0x1] %v387_v57 }
  0xe7   : > { %v555_v8 = vadd.f32 %v554_v6, %v553_v4  ;;  %v575_v9 = vrot.slane %v574_v7, 4  ;;  %v352_v4 = vsel %vm4042_vm6, 0, %v351_v59  ;;  %v3655_v6 = vld [vmem:[%s4843_s2 + $0x68] sm:$0xff] }
  0xe8   : > { %1086 = vmatpush.bf16.msra.mxu3 %v3655_v6  ;;  %353 = vst [vmem:[#allocation2 + $0x18] sm:$0x1] %v352_v4 }
  0xe9   : > { %v556_v10 = vrot.slane %v555_v8, 2  ;;  %v576_v11 = vadd.f32 %v575_v9, %v574_v7  ;;  %v355_v7 = vsel %vm4042_vm6, 0, %v354_v2  ;;  %v3644_v9 = vld [vmem:[%s4843_s2 + $0x10] sm:$0xff] }
  0xea   : > { %1190 = vmatpush.bf16.msrb.mxu2 %v3644_v9  ;;  %356 = vst [vmem:[#allocation2 + $0x20] sm:$0x1] %v355_v7 }
  0xeb   : > { %v557_v12 = vadd.f32 %v556_v10, %v555_v8  ;;  %v577_v14 = vrot.slane %v576_v11, 2  ;;  %v383_v8 = vld [vmem:[#allocation2 + $0x1c] sm:$0x1]  ;;  %v3672_v10 = vld [vmem:[%s4843_s2 + $0xd0] sm:$0xff] }
  0xec   : > { %1493 = vmatpush.bf16.msrb.mxu0 %v3672_v10  ;;  %v3685_v10 = vld [vmem:[%s4843_s2 + $0x138] sm:$0xff] }
  0xed   : > { %v558_v15 = vrot.slane %v557_v12, 1  ;;  %v578_v16 = vadd.f32 %v577_v14, %v576_v11  ;;  %v3661_v11 = vld [vmem:[%s4843_s2 + $0x98] sm:$0xff]  ;;  %v3654_v14 = vld [vmem:[%s4843_s2 + $0x60] sm:$0xff] }
  0xee   : > { %1358 = vmatpush.bf16.msrb.mxu1 %v3661_v11  ;;  %1087 = vmatpush.bf16.msra.mxu3 %v3654_v14 }
  0xef   : > { %v579_v18 = vrot.slane %v578_v16, 1  ;;  %v559_v19 = vadd.f32 %v558_v15, %v557_v12  ;;  %v381_v12 = vsel %vm4062_vm8, 0, %v380_v5  ;;  %v666_v15 = vrot.slane %v664_v63, 7 }
  0xf0   : > { %382 = vst [vmem:[#allocation2 + $0x14] sm:$0x1] %v381_v12 }
  0xf1   : > { %v580_v20 = vadd.f32 %v579_v18, %v578_v16  ;;  %v3643_v16 = vld [vmem:[%s4843_s2 + $0x8] sm:$0xff] }
  0xf2   : > { %v3671_v18 = vld [vmem:[%s4843_s2 + $0xc8] sm:$0xff]  ;;  %1191 = vmatpush.bf16.msrb.mxu2 %v3643_v16  ;;  %v3768_v16 = vunpack.c.l.bf16 %v4006_v3 }
  0xf3   : > { %v582_v13 = vsel %vm339_vm0, %v559_v19, %v580_v20  ;;  %v384_v19 = vsel %vm4062_vm8, 0, %v383_v8  ;;  %v3660_v20 = vld [vmem:[%s4843_s2 + $0x90] sm:$0xff]  ;;  %1494 = vmatpush.bf16.msrb.mxu0 %v3671_v18 }
  0xf4   : > { %616 = vmatmul.f32.vlgmr.msra.gmra.mxu1 %v582_v13  ;;  %v3653_v13 = vld [vmem:[%s4843_s2 + $0x58] sm:$0xff]  ;;  %385 = vst [vmem:[#allocation2 + $0x1c] sm:$0x1] %v384_v19 }
  0xf5   : > { %1359 = vmatpush.bf16.msrb.mxu1 %v3660_v20  ;;  %1088 = vmatpush.bf16.msra.mxu3 %v3653_v13 }
 0x171   : > { %v617_v23 = vpop.f32.mrf.mxu1 }
 0x172   : > { %v620_v24 = vmul.f32 0.001953125, %v617_v23 }
 0x174   : > { %v621_v25 = vmul.f32 %v620_v24, %v620_v24 }
 0x176   : > { %v623_v26 = vrot.slane %v621_v25, 7  ;;  %v375_v25 = vsel %vm4062_vm8, 0, %v374_v22 }
 0x177   : > { %376 = vst [vmem:[#allocation2 + $0x4] sm:$0x1] %v375_v25 }
 0x178   : > { %v625_v27 = vsub.f32 %v620_v24, %v623_v26  ;;  %v357_v26 = vld [vmem:[#allocation2 + $0x28] sm:$0x1] }
 0x17a   : > { %v626_v28 = vadd.f32 1e-05, %v625_v27 }
 0x17c   : > { %3830 = vrsqrt.f32 %v626_v28  ;;  %vm633_vm2 = vweird.f32 %v626_v28 }
 0x182   : > { %v3831_v29 = vpop.eup %3830 }
 0x183   : > { %v628_v31 = vmul.f32 %v3831_v29, %v626_v28  ;;  %vm634_vm1 = vweird.f32 %v3831_v29  ;;  %v3642_v28 = vld [vmem:[%s4843_s2] sm:$0xff] }
 0x184   : > { %vm635_vm3 = vmor %vm633_vm2, %vm634_vm1  ;;  %1192 = vmatpush.bf16.msrb.mxu2 %v3642_v28 }
 0x185   : > { %v629_v32 = vmul.f32 %v3831_v29, %v628_v31  ;;  %v3670_v31 = vld [vmem:[%s4843_s2 + $0xc0] sm:$0xff]  ;;  %vm4248_vm1 = vmor %vm888_vm13, %vm889_vm15 }
 0x186   : > { %1495 = vmatpush.bf16.msrb.mxu0 %v3670_v31 }
 0x187   : > { %v630_v33 = vmul.f32 0.5, %v629_v32 }
 0x189   : > { %v631_v34 = vsub.f32 1.5, %v630_v33  ;;  %v3659_v33 = vld [vmem:[%s4843_s2 + $0x88] sm:$0xff] }
 0x18a   : > { %1360 = vmatpush.bf16.msrb.mxu1 %v3659_v33  ;;  %v808_v33 = vld [vmem:[#allocation2 + $0x8] sm:$0xf] }
 0x18b   : > { %v632_v35 = vmul.f32 %v3831_v29, %v631_v34  ;;  %v669_v34 = vld [vmem:[%s4845_s4 + $0x2] sm:$0x1] }
 0x18d   : > { %v636_v36 = vsel %vm635_vm3, %v3831_v29, %v632_v35  ;;  %v358_v29 = vsel %vm4042_vm6, 0, %v357_v26  ;;  %v3684_v26 = vld [vmem:[%s4843_s2 + $0x130] sm:$0xff] }
 0x18e   : > { %v637_v37 = vsel %vm339_vm0, %v620_v24, %v636_v36  ;;  %v343_v24 = vsel %vm4042_vm6, 0, %v342_v21  ;;  %359 = vst [vmem:[#allocation2 + $0x28] sm:$0x1] %v358_v29  ;;  %v3652_v36 = vld [vmem:[%s4843_s2 + $0x50] sm:$0xff]  ;;  %1361 = vmatpush.bf16.msrb.mxu1 %v3658_v45 }
 0x18f   : > { %3083 = vmatmul.msk.f32.vlgmr.msra.gmra.mxu2 %vm640_vm4, %v637_v37  ;;  %344 = vst [vmem:[#allocation2] sm:$0x1] %v343_v24  ;;  %v360_v37 = vld [vmem:[#allocation2 + $0x30] sm:$0x1]  ;;  %1089 = vmatpush.bf16.msra.mxu3 %v3652_v36  ;;  %v3769_v36 = vunpack.c.h.bf16 %v4006_v3 }
 0x190   : > { %v361_v46 = vsel %vm4042_vm6, 0, %v360_v37  ;;  %v811_v37 = vld [vmem:[#allocation2 + $0xc] sm:$0x1] }
 0x191   : > { %362 = vst [vmem:[#allocation2 + $0x30] sm:$0x1] %v361_v46 }
 0x193   : > { %1090 = vmatpush.bf16.msra.mxu3 %v3651_v30  ;;  %v817_v30 = vld [vmem:[#allocation2 + $0x14] sm:$0x1] }
 0x197   : > { %1091 = vmatpush.bf16.msra.mxu3 %v3650_v0 }
 0x19b   : > { %1734 = vmatpush.bf16.msrb.mxu3 %v3685_v10 }
 0x19f   : > { %1735 = vmatpush.bf16.msrb.mxu3 %v3684_v26 }
 0x212   : > { %v661_v23 = vpop.f32.mrf.mxu2 }
 0x213   : > { %v668_v27 = vmul.f32 %v666_v15, %v661_v23 }
 0x215   : > { %v671_v32 = vrot.slane %v668_v27, 1  ;;  %v4138_v35 = vperm.slane %v668_v27, 1  ;;  %v3708_v27 = vld [vmem:[%s4843_s2 + $0x1d0] sm:$0xff] }
 0x217   : > { %v673_v38 = vmul.f32 %v671_v32, %v661_v23  ;;  %v692_v17 = vmul.f32 %v3756_v39, %v4138_v35  ;;  %v693_v51 = vmul.f32 %v3757_v40, %v4138_v35  ;;  %v694_v52 = vmul.f32 %v3760_v41, %v4138_v35  ;;  %v856_v23 = vld [vmem:[#allocation2] sm:$0xf] }
 0x218   : > { %v695_v53 = vmul.f32 %v3761_v42, %v4138_v35  ;;  %v696_v56 = vmul.f32 %v3764_v49, %v4138_v35  ;;  %v697_v43 = vmul.f32 %v3765_v50, %v4138_v35  ;;  %v698_v24 = vmul.f32 %v3768_v16, %v4138_v35  ;;  %v880_v49 = vld [vmem:[#allocation2 + $0x4] sm:$0x1]  ;;  %v820_v50 = vld [vmem:[#allocation2 + $0x18] sm:$0xf]  ;;  %v3683_v16 = vld [vmem:[%s4843_s2 + $0x128] sm:$0xff] }
 0x219   : > { %v674_v44 = vsub.f32 %v669_v34, %v673_v38  ;;  %v814_v34 = vld [vmem:[#allocation2 + $0x10] sm:$0xf]  ;;  %v892_v38 = vshrl.u32 %v856_v23, 16  ;;  %v895_v39 = vshll.u32 %v856_v23, 16  ;;  %1736 = vmatpush.bf16.msrb.mxu3 %v3683_v16 }
 0x21b   : > { %v4161_v54 = vperm.slane %v674_v44, 0  ;;  %v1214_v44 = vld [vmem:[#allocation2] sm:$0xe] }
 0x21c   : > { %v3180_v57 = vrot.slane %v1214_v44, 9 }
 0x21d   : > { %v701_v58 = vadd.f32 %v4161_v54, %v692_v17  ;;  %v702_v59 = vadd.f32 %v4161_v54, %v693_v51  ;;  %v703_v60 = vadd.f32 %v4161_v54, %v694_v52  ;;  %v704_v61 = vadd.f32 %v4161_v54, %v695_v53  ;;  %v826_v17 = vld [vmem:[#allocation2 + $0x20] sm:$0xf] }
 0x21e   : > { %v705_v62 = vadd.f32 %v4161_v54, %v696_v56  ;;  %v706_v63 = vadd.f32 %v4161_v54, %v697_v43  ;;  %v707_v40 = vadd.f32 %v4161_v54, %v698_v24  ;;  %v699_v43 = vmul.f32 %v3769_v36, %v4138_v35 }
 0x21f   : > { %v709_v1 = vmax.f32 %v701_v58, 0.0  ;;  %v710_v2 = vmax.f32 %v702_v59, 0.0  ;;  %v711_v4 = vmax.f32 %v703_v60, 0.0  ;;  %v712_v5 = vmax.f32 %v704_v61, 0.0  ;;  %v3693_v60 = vld [vmem:[%s4843_s2 + $0x178] sm:$0xff] }
 0x220   : > { %v713_v11 = vmax.f32 %v705_v62, 0.0  ;;  %v714_v12 = vmax.f32 %v706_v63, 0.0  ;;  %v894_v58 = vrot.slane %v892_v38, 4  ;;  %v897_v59 = vrot.slane %v895_v39, 5  ;;  %1908 = vmatpush.bf16.msra.mxu2 %v3693_v60 }
 0x221   : > { %v717_v6 = vpack.c.bf16 %v709_v1, %v709_v1  ;;  %v718_v7 = vpack.c.bf16 %v710_v2, %v710_v2  ;;  %v719_v8 = vpack.c.bf16 %v711_v4, %v711_v4  ;;  %v720_v9 = vpack.c.bf16 %v712_v5, %v712_v5  ;;  %v823_v4 = vld [vmem:[#allocation2 + $0x1c] sm:$0x1] }
 0x222   : > { %v4181_v25 = vpack.c.bf16 %v713_v11, %v713_v11  ;;  %v4191_v28 = vpack.c.bf16 %v714_v12, %v714_v12  ;;  %v1243_v61 = vrot.slane %v880_v49, 5  ;;  %v715_v0 = vmax.f32 %v707_v40, 0.0 }
 0x223   : > { %v726_v14 = vshrl.u32 %v717_v6, 16  ;;  %v734_v15 = vshrl.u32 %v718_v7, 16  ;;  %v729_v18 = vshll.u32 %v717_v6, 16  ;;  %v737_v19 = vshll.u32 %v718_v7, 16  ;;  %v3134_v6 = vld [vmem:[#allocation2] sm:$0xf] }
 0x224   : > { %v742_v21 = vshrl.u32 %v719_v8, 16  ;;  %v750_v22 = vshrl.u32 %v720_v9, 16  ;;  %v758_v46 = vshrl.u32 %v4181_v25, 16  ;;  %v745_v51 = vshll.u32 %v719_v8, 16 }
 0x225   : > { %v728_v20 = vrot.slane %v726_v14, 7  ;;  %v736_v13 = vrot.slane %v734_v15, 7  ;;  %v753_v52 = vshll.u32 %v720_v9, 16  ;;  %v766_v53 = vshrl.u32 %v4191_v28, 16 }
 0x226   : > { %v744_v41 = vrot.slane %v742_v21, 7  ;;  %v4195_v42 = vrot.slane %v750_v22, 7  ;;  %v4210_v2 = vrot.slane %v758_v46, 7  ;;  %v901_v8 = vshll.u32 %v880_v49, 16 }
 0x227   : > { %v731_v29 = vor.u32 %v729_v18, %v728_v20  ;;  %v732_v31 = vrot.slane %v728_v20, 4  ;;  %v739_v32 = vor.u32 %v737_v19, %v736_v13  ;;  %v740_v45 = vrot.slane %v736_v13, 4  ;;  %v3692_v18 = vld [vmem:[%s4843_s2 + $0x170] sm:$0xff]  ;;  %v832_v19 = vld [vmem:[#allocation2 + $0x28] sm:$0xf] }
 0x228   : > { %v747_v62 = vor.u32 %v745_v51, %v744_v41  ;;  %v755_v63 = vor.u32 %v753_v52, %v4195_v42  ;;  %v748_v1 = vrot.slane %v744_v41, 4  ;;  %v4214_v5 = vrot.slane %v766_v53, 7  ;;  %1909 = vmatpush.bf16.msra.mxu2 %v3692_v18  ;;  %v4243_v41 = vld [vmem:[#allocation2 + $0x38] sm:$0x1]  ;;  %v829_v51 = vld [vmem:[#allocation2 + $0x24] sm:$0x1] }
 0x229   : > { %v809_v48 = vsel %vm4187_vm10, %v731_v29, %v808_v33  ;;  %v815_v3 = vsel %vm4187_vm10, %v739_v32, %v814_v34  ;;  %v812_v56 = vsel %vm4042_vm6, %v732_v31, %v811_v37  ;;  %v818_v35 = vsel %vm4042_vm6, %v740_v45, %v817_v30  ;;  %v389_v34 = vld [vmem:[#allocation2 + $0x2c] sm:$0x1] }
 0x22a   : > { %810 = vst [vmem:[#allocation2 + $0x8] sm:$0xf] %v809_v48  ;;  %v821_v9 = vsel %vm4187_vm10, %v747_v62, %v820_v50  ;;  %v827_v10 = vsel %vm4187_vm10, %v755_v63, %v826_v17  ;;  %v761_v11 = vshll.u32 %v4181_v25, 16  ;;  %v898_v12 = vor.u32 %v897_v59, %v894_v58  ;;  %v838_v25 = vld [vmem:[#allocation2 + $0x30] sm:$0xf] }
 0x22b   : > { %816 = vst [vmem:[#allocation2 + $0x10] sm:$0xf] %v815_v3  ;;  %v708_v14 = vadd.f32 %v4161_v54, %v699_v43  ;;  %v769_v15 = vshll.u32 %v4191_v28, 16  ;;  %v4235_v20 = vpack.c.bf16 %v715_v0, %v715_v0  ;;  %v1244_v54 = vsel %vm4218_vm14, %v3180_v57, %v1243_v61 }
 0x22c   : > { %813 = vst [vmem:[#allocation2 + $0xc] sm:$0x1] %v812_v56  ;;  %v824_v23 = vsel %vm4042_vm6, %v748_v1, %v823_v4  ;;  %v763_v24 = vor.u32 %v761_v11, %v4210_v2  ;;  %v903_v32 = vrot.slane %v901_v8, 5  ;;  %v899_v38 = vrot.slane %v898_v12, 4  ;;  %v366_v11 = vld [vmem:[#allocation2 + $0x40] sm:$0x1] }
 0x22d   : > { %819 = vst [vmem:[#allocation2 + $0x14] sm:$0x1] %v818_v35  ;;  %v771_v33 = vor.u32 %v769_v15, %v4214_v5  ;;  %v716_v44 = vmax.f32 %v708_v14, 0.0  ;;  %v756_v45 = vrot.slane %v4195_v42, 4  ;;  %v1290_v48 = vunpack.c.l.b16 %v1244_v54  ;;  %v3713_v42 = vld [vmem:[%s4843_s2 + $0x1f8] sm:$0xff]  ;;  %v3691_v54 = vld [vmem:[%s4843_s2 + $0x168] sm:$0xff] }
 0x22e   : > { %822 = vst [vmem:[#allocation2 + $0x18] sm:$0xf] %v821_v9  ;;  %v833_v30 = vsel %vm4187_vm10, %v763_v24, %v832_v19  ;;  %v774_v52 = vshrl.u32 %v4235_v20, 16  ;;  %v904_v57 = vsel %vm4248_vm1, %v899_v38, %v903_v32  ;;  %2289 = vmatpush.bf16.msra.mxu0 %v3713_v42  ;;  %v390_v60 = vsel %vm4062_vm8, 0, %v389_v34  ;;  %v3682_v19 = vld [vmem:[%s4843_s2 + $0x120] sm:$0xff]  ;;  %1910 = vmatpush.bf16.msra.mxu2 %v3691_v54  ;;  %v3711_v38 = vld [vmem:[%s4843_s2 + $0x1e8] sm:$0xff] }
 0x22f   : > { %828 = vst [vmem:[#allocation2 + $0x20] sm:$0xf] %v827_v10  ;;  %v839_v56 = vsel %vm4187_vm10, %v771_v33, %v838_v25  ;;  %v4266_v61 = vpack.c.bf16 %v716_v44, %v716_v44  ;;  %v830_v35 = vsel %vm4042_vm6, %v756_v45, %v829_v51  ;;  %v364_v4 = vsel %vm4042_vm6, 0, %v4243_v41  ;;  %1737 = vmatpush.bf16.msrb.mxu3 %v3682_v19  ;;  %v3689_v19 = vld [vmem:[%s4843_s2 + $0x158] sm:$0xff] }
 0x230   : > { %825 = vst [vmem:[#allocation2 + $0x1c] sm:$0x1] %v824_v23  ;;  %v1020_v12 = vunpack.c.l.b16 %v904_v57  ;;  %v777_v23 = vshll.u32 %v4235_v20, 16  ;;  %v3705_v20 = vld [vmem:[%s4843_s2 + $0x1b8] sm:$0xff] }
 0x231   : > { %v3638_v13 = vld [vmem:[#allocation2 + $0x4] sm:$0xf0]  ;;  %834 = vst [vmem:[#allocation2 + $0x28] sm:$0xf] %v833_v30  ;;  %v782_v24 = vshrl.u32 %v4266_v61, 16  ;;  %2043 = vmatpush.bf16.msra.mxu1 %v3705_v20  ;;  %v3709_v54 = vld [vmem:[%s4843_s2 + $0x1d8] sm:$0xff] }
 0x232   : > { %v3254_v21 = vld [vmem:[#allocation2 + $0x8] sm:$0xf]  ;;  %v3135_v26 = vor.u32 %v3638_v13, %v3134_v6  ;;  %v3666_v28 = vld [vmem:[#allocation2 + $0xc] sm:$0xf0]  ;;  %840 = vst [vmem:[#allocation2 + $0x30] sm:$0xf] %v839_v56 }
 0x233   : > { %v1215_v22 = vld [vmem:[#allocation2 + $0x8] sm:$0xe]  ;;  %v3255_v36 = vor.u32 %v3666_v28, %v3254_v21  ;;  %v881_v37 = vld [vmem:[#allocation2 + $0xc] sm:$0x1]  ;;  %v858_v59 = vld [vmem:[#allocation2 + $0x10] sm:$0xf] }
 0x234   : > { %v3181_v29 = vrot.slane %v1215_v22, 9  ;;  %v857_v31 = vld [vmem:[#allocation2 + $0x8] sm:$0xf]  ;;  %1193 = vmatmul.bf16.vlgmr.msrb.gmra.mxu2 %v3135_v26  ;;  %v1247_v46 = vrot.slane %v881_v37, 5  ;;  %v915_v17 = vshll.u32 %v881_v37, 16  ;;  %v920_v1 = vshrl.u32 %v858_v59, 16 }
 0x235   : > { %v906_v39 = vshrl.u32 %v857_v31, 16  ;;  %v909_v40 = vshll.u32 %v857_v31, 16  ;;  %1496 = vmatmul.bf16.vlgmr.msrb.gmra.mxu0 %v3255_v36  ;;  %v4268_v62 = vld [vmem:[#allocation2 + $0x14] sm:$0x1]  ;;  %v1216_v63 = vld [vmem:[#allocation2 + $0x10] sm:$0xe] }
 0x236   : > { %v1248_v53 = vsel %vm4218_vm14, %v3181_v29, %v1247_v46  ;;  %v859_v0 = vld [vmem:[#allocation2 + $0x18] sm:$0xf]  ;;  %v917_v9 = vrot.slane %v915_v17, 5  ;;  %v923_v10 = vshll.u32 %v858_v59, 16  ;;  %v922_v15 = vrot.slane %v920_v1, 4  ;;  %v3712_v28 = vld [vmem:[%s4843_s2 + $0x1f0] sm:$0xff] }
 0x237   : > { %v908_v49 = vrot.slane %v906_v39, 4  ;;  %v911_v50 = vrot.slane %v909_v40, 5  ;;  %v1291_v43 = vunpack.c.l.b16 %v1248_v53  ;;  %v1217_v14 = vld [vmem:[#allocation2 + $0x18] sm:$0xe]  ;;  %v934_v16 = vshrl.u32 %v859_v0, 16  ;;  %2290 = vmatpush.bf16.msra.mxu0 %v3712_v28  ;;  %v3690_v53 = vld [vmem:[%s4843_s2 + $0x160] sm:$0xff] }
 0x238   : > { %v937_v18 = vshll.u32 %v859_v0, 16  ;;  %v4280_v21 = vld [vmem:[#allocation2 + $0x1c] sm:$0x1]  ;;  %v925_v22 = vrot.slane %v923_v10, 5  ;;  %391 = vst [vmem:[#allocation2 + $0x2c] sm:$0x1] %v390_v60  ;;  %1911 = vmatpush.bf16.msra.mxu2 %v3690_v53 }
 0x239   : > { %v912_v58 = vor.u32 %v911_v50, %v908_v49  ;;  %v1298_v6 = vpack.c.b16 %v1291_v43, %v1290_v48  ;;  %v936_v26 = vrot.slane %v934_v16, 4  ;;  %831 = vst [vmem:[#allocation2 + $0x24] sm:$0x1] %v830_v35  ;;  %v4290_v29 = vrot.slane %v774_v52, 7  ;;  %v3138_v41 = vld [vmem:[#allocation2 + $0x10] sm:$0xf] }
 0x23a   : > { %v3182_v31 = vrot.slane %v1216_v63, 9  ;;  %v1251_v32 = vrot.slane %v4268_v62, 5  ;;  %v939_v33 = vrot.slane %v937_v18, 5  ;;  %v3183_v36 = vrot.slane %v1217_v14, 9  ;;  %365 = vst [vmem:[#allocation2 + $0x38] sm:$0x1] %v364_v4 }
 0x23b   : > { %v913_v8 = vrot.slane %v912_v58, 4  ;;  %1362 = vmatmul.bf16.vlgmr.msrb.gmra.mxu1 %v1298_v6  ;;  %v1255_v37 = vrot.slane %v4280_v21, 5  ;;  %v367_v39 = vsel %vm4042_vm6, 0, %v366_v11  ;;  %v764_v40 = vrot.slane %v4210_v2, 4  ;;  %v3639_v44 = vld [vmem:[#allocation2 + $0x14] sm:$0xf0]  ;;  %2291 = vmatpush.bf16.msra.mxu0 %v3711_v38 }
 0x23c   : > { %v926_v45 = vor.u32 %v925_v22, %v922_v15  ;;  %v940_v46 = vor.u32 %v939_v33, %v936_v26  ;;  %v3704_v48 = vld [vmem:[%s4843_s2 + $0x1b0] sm:$0xff]  ;;  %v4306_v50 = vrot.slane %v782_v24, 7  ;;  %v3258_v17 = vld [vmem:[#allocation2 + $0x18] sm:$0xf]  ;;  %v3667_v30 = vld [vmem:[#allocation2 + $0x1c] sm:$0xf0]  ;;  %v1252_v2 = vsel %vm4218_vm14, %v3182_v31, %v1251_v32  ;;  %1912 = vmatpush.bf16.msra.mxu2 %v3689_v19 }
 0x23d   : > { %v918_v13 = vsel %vm4248_vm1, %v913_v8, %v917_v9  ;;  %v392_v49 = vld [vmem:[#allocation2 + $0x34] sm:$0x1]  ;;  %v929_v42 = vshll.u32 %v4268_v62, 16  ;;  %v943_v51 = vshll.u32 %v4280_v21, 16  ;;  %v3681_v52 = vld [vmem:[%s4843_s2 + $0x118] sm:$0xff]  ;;  %v785_v56 = vshll.u32 %v4266_v61, 16  ;;  %2044 = vmatpush.bf16.msra.mxu1 %v3704_v48 }
 0x23e   : > { %v1021_v25 = vunpack.c.l.b16 %v918_v13  ;;  %368 = vst [vmem:[#allocation2 + $0x40] sm:$0x1] %v367_v39  ;;  %v3139_v43 = vor.u32 %v3639_v44, %v3138_v41  ;;  %v1256_v57 = vsel %vm4218_vm14, %v3183_v36, %v1255_v37  ;;  %v860_v59 = vld [vmem:[#allocation2 + $0x20] sm:$0xf]  ;;  %v779_v62 = vor.u32 %v777_v23, %v4290_v29  ;;  %v861_v61 = vld [vmem:[#allocation2 + $0x28] sm:$0xf]  ;;  %1738 = vmatpush.bf16.msrb.mxu3 %v3681_v52 }
 0x23f   : > { %v835_v58 = vld [vmem:[#allocation2 + $0x2c] sm:$0x1]  ;;  %v3710_v60 = vld [vmem:[%s4843_s2 + $0x1e0] sm:$0xff]  ;;  %v3259_v63 = vor.u32 %v3667_v30, %v3258_v17  ;;  %v927_v0 = vrot.slane %v926_v45, 4  ;;  %v941_v1 = vrot.slane %v940_v46, 4  ;;  %v1292_v6 = vunpack.c.l.b16 %v1252_v2  ;;  %v3680_v23 = vld [vmem:[%s4843_s2 + $0x110] sm:$0xff] }
 0x240   : > { %v1028_v34 = vpack.c.b16 %v1021_v25, %v1020_v12  ;;  %v836_v35 = vsel %vm4042_vm6, %v764_v40, %v835_v58  ;;  %v3703_v4 = vld [vmem:[%s4843_s2 + $0x1a8] sm:$0xff]  ;;  %v931_v8 = vrot.slane %v929_v42, 5  ;;  %v787_v9 = vor.u32 %v785_v56, %v4306_v50  ;;  %v395_v11 = vld [vmem:[#allocation2 + $0x3c] sm:$0x1]  ;;  %2292 = vmatpush.bf16.msra.mxu0 %v3710_v60  ;;  %v1218_v28 = vld [vmem:[#allocation2 + $0x20] sm:$0xe] }
 0x241   : > { %837 = vst [vmem:[#allocation2 + $0x2c] sm:$0x1] %v836_v35  ;;  %v393_v10 = vsel %vm4062_vm8, 0, %v392_v49  ;;  %v1293_v12 = vunpack.c.l.b16 %v1256_v57  ;;  %v945_v14 = vrot.slane %v943_v51, 5  ;;  %v948_v15 = vshrl.u32 %v860_v59, 16  ;;  %2045 = vmatpush.bf16.msra.mxu1 %v3703_v4  ;;  %v3702_v32 = vld [vmem:[%s4843_s2 + $0x1a0] sm:$0xff] }
 0x242   : > { %1092 = vmatmul.bf16.vlgmr.msra.gmra.mxu3 %v1028_v34  ;;  %v951_v16 = vshll.u32 %v860_v59, 16  ;;  %v844_v18 = vld [vmem:[#allocation2 + $0x38] sm:$0xf]  ;;  %v962_v13 = vshrl.u32 %v861_v61, 16  ;;  %v965_v21 = vshll.u32 %v861_v61, 16  ;;  %v932_v24 = vsel %vm4248_vm1, %v927_v0, %v931_v8  ;;  %v3688_v46 = vld [vmem:[%s4843_s2 + $0x150] sm:$0xff] }
 0x243   : > { %v845_v22 = vsel %vm4187_vm10, %v779_v62, %v844_v18  ;;  %v946_v25 = vsel %vm4248_vm1, %v941_v1, %v945_v14  ;;  %v396_v26 = vsel %vm4062_vm8, 0, %v395_v11  ;;  %1739 = vmatpush.bf16.msrb.mxu3 %v3680_v23  ;;  %394 = vst [vmem:[#allocation2 + $0x34] sm:$0x1] %v393_v10  ;;  %v1299_v33 = vpack.c.b16 %v1293_v12, %v1292_v6  ;;  %v1219_v20 = vld [vmem:[#allocation2 + $0x28] sm:$0xe]  ;;  %v3701_v17 = vld [vmem:[%s4843_s2 + $0x198] sm:$0xff] }
 0x244   : > { %1198 = vmatmul.bf16.gmra.mxu2 %v3139_v43  ;;  %846 = vst [vmem:[#allocation2 + $0x38] sm:$0xf] %v845_v22  ;;  %v950_v34 = vrot.slane %v948_v15, 4  ;;  %v953_v36 = vrot.slane %v951_v16, 5  ;;  %v1022_v38 = vunpack.c.l.b16 %v932_v24  ;;  %v1023_v39 = vunpack.c.l.b16 %v946_v25  ;;  %v884_v40 = vld [vmem:[#allocation2 + $0x24] sm:$0x1]  ;;  %2293 = vmatpush.bf16.msra.mxu0 %v3709_v54 }
 0x245   : > { %1501 = vmatmul.bf16.gmra.mxu0 %v3259_v63  ;;  %v850_v31 = vld [vmem:[#allocation2 + $0x40] sm:$0xf]  ;;  %397 = vst [vmem:[#allocation2 + $0x3c] sm:$0x1] %v396_v26  ;;  %v964_v41 = vrot.slane %v962_v13, 4  ;;  %v967_v44 = vrot.slane %v965_v21, 5  ;;  %2046 = vmatpush.bf16.msra.mxu1 %v3702_v32 }
 0x246   : > { %v851_v37 = vsel %vm4187_vm10, %v787_v9, %v850_v31  ;;  %v772_v48 = vrot.slane %v4214_v5, 4  ;;  %v3142_v49 = vld [vmem:[#allocation2 + $0x20] sm:$0xf]  ;;  %v780_v30 = vrot.slane %v4290_v29, 4  ;;  %v3640_v42 = vld [vmem:[#allocation2 + $0x24] sm:$0xf0]  ;;  %v954_v52 = vor.u32 %v953_v36, %v950_v34  ;;  %1913 = vmatpush.bf16.msra.mxu2 %v3688_v46 }
 0x247   : > { %852 = vst [vmem:[#allocation2 + $0x40] sm:$0xf] %v851_v37  ;;  %v3184_v2 = vrot.slane %v1218_v28, 9  ;;  %v3185_v51 = vrot.slane %v1219_v20, 9  ;;  %v3687_v53 = vld [vmem:[%s4843_s2 + $0x148] sm:$0xff]  ;;  %v1029_v56 = vpack.c.b16 %v1023_v39, %v1022_v38  ;;  %v1259_v5 = vrot.slane %v884_v40, 5 }
 0x248   : > { %v885_v45 = vld [vmem:[#allocation2 + $0x2c] sm:$0x1]  ;;  %v3262_v43 = vld [vmem:[#allocation2 + $0x28] sm:$0xf]  ;;  %v968_v58 = vor.u32 %v967_v44, %v964_v41  ;;  %2294 = vmatpush.bf16.msra.mxu0 %v3708_v27  ;;  %v3668_v29 = vld [vmem:[#allocation2 + $0x2c] sm:$0xf0]  ;;  %v3143_v4 = vor.u32 %v3640_v42, %v3142_v49 }
 0x249   : > { %v1263_v57 = vrot.slane %v885_v45, 5  ;;  %v3707_v59 = vld [vmem:[%s4843_s2 + $0x1c8] sm:$0xff]  ;;  %v957_v60 = vshll.u32 %v884_v40, 16  ;;  %v971_v63 = vshll.u32 %v885_v45, 16  ;;  %2047 = vmatpush.bf16.msra.mxu1 %v3701_v17  ;;  %v3700_v35 = vld [vmem:[%s4843_s2 + $0x190] sm:$0xff]  ;;  %v955_v6 = vrot.slane %v954_v52, 4 }
 0x24a   : > { %v841_v62 = vld [vmem:[#allocation2 + $0x34] sm:$0x1]  ;;  %v3679_v61 = vld [vmem:[%s4843_s2 + $0x108] sm:$0xff]  ;;  %1914 = vmatpush.bf16.msra.mxu2 %v3687_v53  ;;  %v862_v9 = vld [vmem:[#allocation2 + $0x30] sm:$0xf]  ;;  %v1260_v11 = vsel %vm4218_vm14, %v3184_v2, %v1259_v5  ;;  %v969_v14 = vrot.slane %v968_v58, 4  ;;  %v3263_v16 = vor.u32 %v3668_v29, %v3262_v43 }
 0x24b   : > { %1367 = vmatmul.bf16.gmra.mxu1 %v1299_v33  ;;  %v842_v0 = vsel %vm4042_vm6, %v772_v48, %v841_v62  ;;  %v3686_v10 = vld [vmem:[%s4843_s2 + $0x140] sm:$0xff]  ;;  %v1264_v12 = vsel %vm4218_vm14, %v3185_v51, %v1263_v57  ;;  %1740 = vmatpush.bf16.msrb.mxu3 %v3679_v61  ;;  %v959_v18 = vrot.slane %v957_v60, 5  ;;  %v973_v19 = vrot.slane %v971_v63, 5  ;;  %v863_v13 = vld [vmem:[#allocation2 + $0x38] sm:$0xf]  ;;  %v3699_v54 = vld [vmem:[%s4843_s2 + $0x188] sm:$0xff] }
 0x24c   : > { %v847_v1 = vld [vmem:[#allocation2 + $0x3c] sm:$0x1]  ;;  %843 = vst [vmem:[#allocation2 + $0x34] sm:$0x1] %v842_v0  ;;  %2295 = vmatpush.bf16.msra.mxu0 %v3707_v59  ;;  %v3706_v15 = vld [vmem:[%s4843_s2 + $0x1c0] sm:$0xff]  ;;  %v976_v21 = vshrl.u32 %v862_v9, 16  ;;  %v1294_v23 = vunpack.c.l.b16 %v1260_v11  ;;  %v1295_v24 = vunpack.c.l.b16 %v1264_v12 }
 0x24d   : > { %v848_v8 = vsel %vm4042_vm6, %v780_v30, %v847_v1  ;;  %2048 = vmatpush.bf16.msra.mxu1 %v3700_v35  ;;  %v979_v22 = vshll.u32 %v862_v9, 16  ;;  %v960_v25 = vsel %vm4248_vm1, %v955_v6, %v959_v18  ;;  %v4397_v26 = vld [vmem:[#allocation2 + $0x30] sm:$0xe]  ;;  %v974_v28 = vsel %vm4248_vm1, %v969_v14, %v973_v19  ;;  %v3678_v32 = vld [vmem:[%s4843_s2 + $0x100] sm:$0xff]  ;;  %v2082_v34 = vld [vmem:[#allocation2 + $0x18] sm:$0xf] }
 0x24e   : > { %849 = vst [vmem:[#allocation2 + $0x3c] sm:$0x1] %v848_v8  ;;  %1915 = vmatpush.bf16.msra.mxu2 %v3686_v10  ;;  %v2080_v31 = vld [vmem:[#allocation2 + $0x10] sm:$0xf]  ;;  %v990_v33 = vshrl.u32 %v863_v13, 16  ;;  %v993_v20 = vshll.u32 %v863_v13, 16  ;;  %v1024_v36 = vunpack.c.l.b16 %v960_v25  ;;  %v1300_v41 = vpack.c.b16 %v1295_v24, %v1294_v23 }
 0x24f   : > { %v3186_v37 = vrot.slane %v4397_v26, 9  ;;  %v978_v38 = vrot.slane %v976_v21, 4  ;;  %v981_v39 = vrot.slane %v979_v22, 5  ;;  %v3698_v40 = vld [vmem:[%s4843_s2 + $0x180] sm:$0xff]  ;;  %1741 = vmatpush.bf16.msrb.mxu3 %v3678_v32  ;;  %v1025_v44 = vunpack.c.l.b16 %v974_v28  ;;  %v1221_v27 = vld [vmem:[#allocation2 + $0x38] sm:$0xe] }
 0x250   : > { %2296 = vmatpush.bf16.msra.mxu0 %v3706_v15  ;;  %v2097_v45 = vshrl.u32 %v2080_v31, 16  ;;  %v2100_v46 = vshll.u32 %v2080_v31, 16  ;;  %v4408_v48 = vld [vmem:[#allocation2 + $0xc] sm:$0x1]  ;;  %v2111_v49 = vshrl.u32 %v2082_v34, 16  ;;  %v2114_v17 = vshll.u32 %v2082_v34, 16 }
 0x251   : > { %2049 = vmatpush.bf16.msra.mxu1 %v3699_v54  ;;  %v3146_v30 = vld [vmem:[#allocation2 + $0x30] sm:$0xf]  ;;  %v992_v51 = vrot.slane %v990_v33, 4  ;;  %v995_v52 = vrot.slane %v993_v20, 5  ;;  %v4410_v53 = vld [vmem:[#allocation2 + $0x14] sm:$0x1]  ;;  %v982_v5 = vor.u32 %v981_v39, %v978_v38  ;;  %v1030_v58 = vpack.c.b16 %v1025_v44, %v1024_v36 }
 0x252   : > { %1097 = vmatmul.bf16.gmra.mxu3 %v1029_v56  ;;  %v3641_v56 = vld [vmem:[#allocation2 + $0x34] sm:$0xf0]  ;;  %v1771_v57 = vld [vmem:[#allocation2 + $0x8] sm:$0xe]  ;;  %v3187_v59 = vrot.slane %v1221_v27, 9  ;;  %v2099_v60 = vrot.slane %v2097_v45, 4 }
 0x253   : > { %v886_v42 = vld [vmem:[#allocation2 + $0x34] sm:$0x1]  ;;  %v3266_v43 = vld [vmem:[#allocation2 + $0x38] sm:$0xf]  ;;  %v1772_v29 = vld [vmem:[#allocation2 + $0x10] sm:$0xe]  ;;  %v3147_v11 = vor.u32 %v3641_v56, %v3146_v30 }
 0x254   : > { %1203 = vmatmul.bf16.gmra.mxu2 %v3143_v4  ;;  %v2102_v62 = vrot.slane %v2100_v46, 5  ;;  %v3669_v63 = vld [vmem:[#allocation2 + $0x3c] sm:$0xf0]  ;;  %v1267_v0 = vrot.slane %v886_v42, 5  ;;  %v2113_v35 = vrot.slane %v2111_v49, 4  ;;  %v2116_v61 = vrot.slane %v2114_v17, 5 }
 0x255   : > { %1506 = vmatmul.bf16.gmra.mxu0 %v3263_v16  ;;  %v887_v2 = vld [vmem:[#allocation2 + $0x3c] sm:$0x1]  ;;  %2050 = vmatpush.bf16.msra.mxu1 %v3698_v40  ;;  %v996_v4 = vor.u32 %v995_v52, %v992_v51  ;;  %v3348_v6 = vrot.slane %v1771_v57, 9  ;;  %v1797_v8 = vrot.slane %v4408_v48, 5  ;;  %v1525_v9 = vld [vmem:[#allocation2 + $0x8] sm:$0xf]  ;;  %v3267_v19 = vor.u32 %v3669_v63, %v3266_v43 }
 0x256   : > { %v1271_v1 = vrot.slane %v887_v2, 5  ;;  %v1551_v10 = vshll.u32 %v4408_v48, 16  ;;  %v985_v12 = vshll.u32 %v886_v42, 16  ;;  %v3349_v14 = vrot.slane %v1772_v29, 9  ;;  %v4415_v16 = vld [vmem:[#allocation2 + $0x14] sm:$0x1] }
 0x257   : > { %v1801_v15 = vrot.slane %v4410_v53, 5  ;;  %v3721_v18 = vld [vmem:[%s4843_s2 + $0x238] sm:$0xff]  ;;  %v983_v13 = vrot.slane %v982_v5, 4  ;;  %v999_v21 = vshll.u32 %v887_v2, 16  ;;  %v2103_v22 = vor.u32 %v2102_v62, %v2099_v60  ;;  %v1527_v54 = vld [vmem:[#allocation2 + $0x10] sm:$0xf] }
 0x258   : > { %v1268_v23 = vsel %vm4218_vm14, %v3186_v37, %v1267_v0  ;;  %v1272_v24 = vsel %vm4218_vm14, %v3187_v59, %v1271_v1  ;;  %v4424_v25 = vld [vmem:[#allocation2 + $0x1c] sm:$0x1]  ;;  %v2117_v26 = vor.u32 %v2116_v61, %v2113_v35  ;;  %v1542_v28 = vshrl.u32 %v1525_v9, 16  ;;  %2463 = vmatpush.bf16.msra.mxu3 %v3721_v18  ;;  %v2084_v39 = vld [vmem:[#allocation2 + $0x20] sm:$0xf]  ;;  %v3720_v27 = vld [vmem:[%s4843_s2 + $0x230] sm:$0xff] }
 0x259   : > { %v997_v31 = vrot.slane %v996_v4, 4  ;;  %v1798_v32 = vsel %vm4218_vm14, %v3348_v6, %v1797_v8  ;;  %v2106_v33 = vshll.u32 %v4415_v16, 16  ;;  %v1545_v20 = vshll.u32 %v1525_v9, 16  ;;  %v2086_v46 = vld [vmem:[#allocation2 + $0x28] sm:$0xf]  ;;  %v3733_v8 = vld [vmem:[%s4844_s3 + $0x38] sm:$0xff] }
 0x25a   : > { %v987_v34 = vrot.slane %v985_v12, 5  ;;  %v1802_v36 = vsel %vm4218_vm14, %v3349_v14, %v1801_v15  ;;  %v1556_v37 = vshrl.u32 %v1527_v54, 16  ;;  %v1559_v38 = vshll.u32 %v1527_v54, 16  ;;  %v1529_v9 = vld [vmem:[#allocation2 + $0x18] sm:$0xf]  ;;  %2660 = vmatpush.bf16.msrb.mxu2 %v3733_v8 }
 0x25b   : > { %1372 = vmatmul.bf16.gmra.mxu1 %v1300_v41  ;;  %v1296_v40 = vunpack.c.l.b16 %v1268_v23  ;;  %v1297_v41 = vunpack.c.l.b16 %v1272_v24  ;;  %v1001_v44 = vrot.slane %v999_v21, 5  ;;  %v2120_v45 = vshll.u32 %v4424_v25, 16  ;;  %v1773_v14 = vld [vmem:[#allocation2 + $0x18] sm:$0xe]  ;;  %v1531_v54 = vld [vmem:[#allocation2 + $0x20] sm:$0xf] }
 0x25c   : > { %v988_v49 = vsel %vm4248_vm1, %v983_v13, %v987_v34  ;;  %v2104_v17 = vrot.slane %v2103_v22, 4  ;;  %v2118_v30 = vrot.slane %v2117_v26, 4  ;;  %v1544_v42 = vrot.slane %v1542_v28, 4  ;;  %2464 = vmatpush.bf16.msra.mxu3 %v3720_v27  ;;  %v4449_v22 = vld [vmem:[#allocation2 + $0x1c] sm:$0x1] }
 0x25d   : > { %v1002_v2 = vsel %vm4248_vm1, %v997_v31, %v1001_v44  ;;  %v1547_v51 = vrot.slane %v1545_v20, 5  ;;  %v2125_v52 = vshrl.u32 %v2084_v39, 16  ;;  %v2128_v56 = vshll.u32 %v2084_v39, 16  ;;  %v4451_v26 = vld [vmem:[#allocation2 + $0x10] sm:$0xf]  ;;  %v3719_v44 = vld [vmem:[%s4843_s2 + $0x228] sm:$0xff] }
 0x25e   : > { %v1558_v43 = vrot.slane %v1556_v37, 4  ;;  %v1561_v5 = vrot.slane %v1559_v38, 5  ;;  %v2139_v57 = vshrl.u32 %v2086_v46, 16  ;;  %v1301_v59 = vpack.c.b16 %v1297_v41, %v1296_v40  ;;  %v4453_v28 = vld [vmem:[#allocation2 + $0x14] sm:$0xf0] }
 0x25f   : > { %v1844_v29 = vunpack.c.l.b16 %v1798_v32  ;;  %v1845_v60 = vunpack.c.l.b16 %v1802_v36  ;;  %v2108_v62 = vrot.slane %v2106_v33, 5  ;;  %v1026_v63 = vunpack.c.l.b16 %v988_v49  ;;  %v1774_v31 = vld [vmem:[#allocation2 + $0x20] sm:$0xe]  ;;  %v4455_v32 = vld [vmem:[#allocation2 + $0x24] sm:$0x1] }
 0x260   : > { %v1027_v0 = vunpack.c.l.b16 %v1002_v2  ;;  %v2122_v1 = vrot.slane %v2120_v45, 5  ;;  %v1548_v61 = vor.u32 %v1547_v51, %v1544_v42  ;;  %v2127_v4 = vrot.slane %v2125_v52, 4  ;;  %v4459_v36 = vld [vmem:[#allocation2 + $0x2c] sm:$0x1]  ;;  %v3732_v45 = vld [vmem:[%s4844_s3 + $0x30] sm:$0xff]  ;;  %2465 = vmatpush.bf16.msra.mxu3 %v3719_v44 }
 0x261   : > { %v2109_v35 = vsel %vm4248_vm1, %v2104_v17, %v2108_v62  ;;  %v2130_v6 = vrot.slane %v2128_v56, 5  ;;  %v1562_v12 = vor.u32 %v1561_v5, %v1558_v43  ;;  %v2141_v15 = vrot.slane %v2139_v57, 4  ;;  %2661 = vmatpush.bf16.msrb.mxu2 %v3732_v45  ;;  %v2088_v52 = vld [vmem:[#allocation2 + $0x30] sm:$0xf]  ;;  %v4477_v62 = vld [vmem:[#allocation2 + $0x2c] sm:$0x1] }
 0x262   : > { %1102 = vmatmul.bf16.gmra.mxu3 %v1030_v58  ;;  %v2142_v58 = vshll.u32 %v2086_v46, 16  ;;  %v1553_v13 = vrot.slane %v1551_v10, 5  ;;  %v1565_v21 = vshll.u32 %v4410_v53, 16  ;;  %v1031_v23 = vpack.c.b16 %v1027_v0, %v1026_v63  ;;  %v4457_v10 = vld [vmem:[#allocation2 + $0x24] sm:$0x1]  ;;  %v3731_v45 = vld [vmem:[%s4844_s3 + $0x28] sm:$0xff] }
 0x263   : > { %v2225_v24 = vunpack.c.l.b16 %v2109_v35  ;;  %v1570_v33 = vshrl.u32 %v1529_v9, 16  ;;  %v1573_v20 = vshll.u32 %v1529_v9, 16  ;;  %v1549_v48 = vrot.slane %v1548_v61, 4 }
 0x264   : > { %1208 = vmatmul.bf16.gmra.mxu2 %v3147_v11  ;;  %v2123_v11 = vsel %vm4248_vm1, %v2118_v30, %v2122_v1  ;;  %v2144_v18 = vrot.slane %v2142_v58, 5  ;;  %v3350_v53 = vrot.slane %v1773_v14, 9  ;;  %v2131_v37 = vor.u32 %v2130_v6, %v2127_v4  ;;  %v1775_v1 = vld [vmem:[#allocation2 + $0x28] sm:$0xe]  ;;  %v3718_v4 = vld [vmem:[%s4843_s2 + $0x220] sm:$0xff] }
 0x265   : > { %1511 = vmatmul.bf16.gmra.mxu0 %v3267_v19  ;;  %v1852_v19 = vpack.c.b16 %v1845_v60, %v1844_v29  ;;  %v2226_v34 = vunpack.c.l.b16 %v2123_v11  ;;  %v1563_v38 = vrot.slane %v1562_v12, 4  ;;  %v1584_v40 = vshrl.u32 %v1531_v54, 16  ;;  %v4486_v12 = vld [vmem:[#allocation2 + $0x34] sm:$0x1]  ;;  %v1776_v14 = vld [vmem:[#allocation2 + $0x30] sm:$0xe]  ;;  %2466 = vmatpush.bf16.msra.mxu3 %v3718_v4 }
 0x266   : > { %v2145_v39 = vor.u32 %v2144_v18, %v2141_v15  ;;  %v1587_v41 = vshll.u32 %v1531_v54, 16  ;;  %v1567_v46 = vrot.slane %v1565_v21, 5  ;;  %v1805_v27 = vrot.slane %v4449_v22, 5  ;;  %v2090_v21 = vld [vmem:[#allocation2 + $0x38] sm:$0xf]  ;;  %2662 = vmatpush.bf16.msrb.mxu2 %v3731_v45 }
 0x267   : > { %v3351_v49 = vrot.slane %v1774_v31, 9  ;;  %v2134_v17 = vshll.u32 %v4455_v32, 16  ;;  %v1809_v30 = vrot.slane %v4457_v10, 5  ;;  %v2148_v42 = vshll.u32 %v4459_v36, 16  ;;  %v398_v54 = vld [vmem:[#allocation2 + $0x44] sm:$0x1] }
 0x268   : > { %v1572_v2 = vrot.slane %v1570_v33, 4  ;;  %v1575_v51 = vrot.slane %v1573_v20, 5  ;;  %v2233_v56 = vpack.c.b16 %v2226_v34, %v2225_v24  ;;  %v3423_v43 = vor.u32 %v4453_v28, %v4451_v26 }
 0x269   : > { %v1554_v5 = vsel %vm4248_vm1, %v1549_v48, %v1553_v13  ;;  %v2132_v57 = vrot.slane %v2131_v37, 4  ;;  %v1568_v58 = vsel %vm4248_vm1, %v1563_v38, %v1567_v46  ;;  %v1586_v29 = vrot.slane %v1584_v40, 4  ;;  %v369_v48 = vld [vmem:[#allocation2 + $0x48] sm:$0x1]  ;;  %v401_v38 = vld [vmem:[#allocation2 + $0x4c] sm:$0x1] }
 0x26a   : > { %v1589_v60 = vrot.slane %v1587_v41, 5  ;;  %v1806_v63 = vsel %vm4218_vm14, %v3350_v53, %v1805_v27  ;;  %v2136_v0 = vrot.slane %v2134_v17, 5  ;;  %v2153_v35 = vshrl.u32 %v2088_v52, 16 }
 0x26b   : > { %1377 = vmatmul.bf16.gmra.mxu1 %v1301_v59  ;;  %v2146_v59 = vrot.slane %v2145_v39, 4  ;;  %v2156_v61 = vshll.u32 %v2088_v52, 16  ;;  %v1670_v6 = vunpack.c.l.b16 %v1554_v5  ;;  %v1810_v8 = vsel %vm4218_vm14, %v3351_v49, %v1809_v30  ;;  %v4501_v30 = vld [vmem:[#allocation2 + $0x34] sm:$0x1] }
 0x26c   : > { %v2150_v9 = vrot.slane %v2148_v42, 5  ;;  %v1576_v11 = vor.u32 %v1575_v51, %v1572_v2  ;;  %v1671_v15 = vunpack.c.l.b16 %v1568_v58  ;;  %v2137_v18 = vsel %vm4248_vm1, %v2132_v57, %v2136_v0  ;;  %v1533_v51 = vld [vmem:[#allocation2 + $0x28] sm:$0xf]  ;;  %v2326_v0 = vld [vmem:[#allocation2 + $0x10] sm:$0xe] }
 0x26d   : > { %v1593_v13 = vshll.u32 %v4457_v10, 16  ;;  %v1590_v24 = vor.u32 %v1589_v60, %v1586_v29  ;;  %v3352_v26 = vrot.slane %v1775_v1, 9  ;;  %v1813_v28 = vrot.slane %v4477_v62, 5 }
 0x26e   : > { %v3353_v31 = vrot.slane %v1776_v14, 9  ;;  %v1817_v33 = vrot.slane %v4486_v12, 5  ;;  %v2155_v20 = vrot.slane %v2153_v35, 4  ;;  %v2158_v34 = vrot.slane %v2156_v61, 5  ;;  %v4517_v35 = vld [vmem:[#allocation2 + $0x3c] sm:$0x1] }
 0x26f   : > { %v1577_v53 = vrot.slane %v1576_v11, 4  ;;  %v2170_v37 = vshll.u32 %v2090_v21, 16  ;;  %v399_v10 = vsel %vm4062_vm8, 0, %v398_v54  ;;  %v1678_v39 = vpack.c.b16 %v1671_v15, %v1670_v6  ;;  %v3717_v6 = vld [vmem:[%s4843_s2 + $0x218] sm:$0xff] }
 0x270   : > { %v1846_v40 = vunpack.c.l.b16 %v1806_v63  ;;  %v1847_v41 = vunpack.c.l.b16 %v1810_v8  ;;  %400 = vst [vmem:[#allocation2 + $0x44] sm:$0x1] %v399_v10  ;;  %v2227_v46 = vunpack.c.l.b16 %v2137_v18  ;;  %v1591_v49 = vrot.slane %v1590_v24, 4  ;;  %v2327_v15 = vld [vmem:[#allocation2 + $0x18] sm:$0xe]  ;;  %2467 = vmatpush.bf16.msra.mxu3 %v3717_v6 }
 0x271   : > { %v1595_v17 = vrot.slane %v1593_v13, 5  ;;  %v1814_v42 = vsel %vm4218_vm14, %v3352_v26, %v1813_v28  ;;  %v2159_v2 = vor.u32 %v2158_v34, %v2155_v20  ;;  %v370_v52 = vsel %vm4042_vm6, 0, %v369_v48  ;;  %v3695_v24 = vld [vmem:[#allocation2 + $0x24] sm:$0xf0] }
 0x272   : > { %1107 = vmatmul.bf16.gmra.mxu3 %v1031_v23  ;;  %v2151_v23 = vsel %vm4248_vm1, %v2146_v59, %v2150_v9  ;;  %v1818_v5 = vsel %vm4218_vm14, %v3353_v31, %v1817_v33  ;;  %v2172_v58 = vrot.slane %v2170_v37, 5  ;;  %v1535_v59 = vld [vmem:[#allocation2 + $0x30] sm:$0xf]  ;;  %371 = vst [vmem:[#allocation2 + $0x48] sm:$0x1] %v370_v52  ;;  %v788_v29 = vrot.slane %v4306_v50, 4 }
 0x273   : > { %v2228_v27 = vunpack.c.l.b16 %v2151_v23  ;;  %v1853_v60 = vpack.c.b16 %v1847_v41, %v1846_v40  ;;  %v2162_v63 = vshll.u32 %v4501_v30, 16  ;;  %v1596_v55 = vsel %vm4248_vm1, %v1591_v49, %v1595_v17  ;;  %v3730_v50 = vld [vmem:[%s4844_s3 + $0x20] sm:$0xff]  ;;  %v3729_v37 = vld [vmem:[%s4844_s3 + $0x18] sm:$0xff] }
 0x274   : > { %1916 = vmatmul.bf16.vlgmr.msra.gmra.mxu2 %v1852_v19  ;;  %v1579_v19 = vshll.u32 %v4449_v22, 16  ;;  %v2167_v22 = vshrl.u32 %v2090_v21, 16  ;;  %v1848_v1 = vunpack.c.l.b16 %v1814_v42  ;;  %v1598_v61 = vshrl.u32 %v1533_v51, 16  ;;  %v3426_v23 = vld [vmem:[#allocation2 + $0x20] sm:$0xf]  ;;  %2468 = vmatpush.bf16.msra.mxu3 %v3716_v47 }
 0x275   : > { %2297 = vmatmul.bf16.vlgmr.msra.gmra.mxu0 %v2233_v56  ;;  %v402_v56 = vsel %vm4062_vm8, 0, %v401_v38  ;;  %v1601_v4 = vshll.u32 %v1533_v51, 16  ;;  %v2234_v8 = vpack.c.b16 %v2228_v27, %v2227_v46  ;;  %v1849_v11 = vunpack.c.l.b16 %v1818_v5  ;;  %2663 = vmatpush.bf16.msrb.mxu2 %v3730_v50  ;;  %v2329_v51 = vld [vmem:[#allocation2 + $0x28] sm:$0xe] }
 0x276   : > { %v1581_v44 = vrot.slane %v1579_v19, 5  ;;  %v2169_v57 = vrot.slane %v2167_v22, 4  ;;  %403 = vst [vmem:[#allocation2 + $0x4c] sm:$0x1] %v402_v56  ;;  %v2160_v14 = vrot.slane %v2159_v2, 4  ;;  %v1612_v19 = vshrl.u32 %v1535_v59, 16 }
 0x277   : > { %v1615_v13 = vshll.u32 %v1535_v59, 16  ;;  %v853_v21 = vld [vmem:[#allocation2 + $0x44] sm:$0x1]  ;;  %v3516_v54 = vrot.slane %v2326_v0, 9  ;;  %v4527_v26 = vunpack.c.l.b16 %v1596_v55  ;;  %v2164_v28 = vrot.slane %v2162_v63, 5 }
 0x278   : > { %v2173_v18 = vor.u32 %v2172_v58, %v2169_v57  ;;  %v2176_v31 = vshll.u32 %v4517_v35, 16  ;;  %v854_v33 = vsel %vm4042_vm6, %v788_v29, %v853_v21  ;;  %v1600_v20 = vrot.slane %v1598_v61, 4  ;;  %v2092_v2 = vld [vmem:[#allocation2 + $0x40] sm:$0xf]  ;;  %v4554_v56 = vld [vmem:[#allocation2 + $0x3c] sm:$0x1] }
 0x279   : > { %v1603_v34 = vrot.slane %v1601_v4, 5  ;;  %v1607_v48 = vshll.u32 %v4477_v62, 16  ;;  %855 = vst [vmem:[#allocation2 + $0x44] sm:$0x1] %v854_v33  ;;  %v2165_v22 = vsel %vm4248_vm1, %v2160_v14, %v2164_v28  ;;  %v3517_v10 = vrot.slane %v2327_v15, 9  ;;  %2664 = vmatpush.bf16.msrb.mxu2 %v3729_v37  ;;  %v3728_v4 = vld [vmem:[%s4844_s3 + $0x10] sm:$0xff] }
 0x27a   : > { %v2174_v38 = vrot.slane %v2173_v18, 4  ;;  %v1617_v40 = vrot.slane %v1615_v13, 5  ;;  %v3427_v41 = vor.u32 %v3695_v24, %v3426_v23  ;;  %v1621_v45 = vshll.u32 %v4486_v12, 16  ;;  %v2094_v12 = vld [vmem:[#allocation2 + $0x48] sm:$0xf] }
 0x27b   : > { %2051 = vmatmul.bf16.vlgmr.msra.gmra.mxu1 %v3423_v43  ;;  %v1582_v43 = vsel %vm4248_vm1, %v1577_v53, %v1581_v44  ;;  %v2352_v53 = vrot.slane %v4415_v16, 5  ;;  %v2328_v16 = vld [vmem:[#allocation2 + $0x20] sm:$0xe]  ;;  %v4544_v44 = vpack.c.b16 %v1849_v11, %v1848_v1  ;;  %v2356_v46 = vrot.slane %v4424_v25, 5  ;;  %v2330_v0 = vld [vmem:[#allocation2 + $0x30] sm:$0xe] }
 0x27c   : > { %v4525_v9 = vunpack.c.l.b16 %v1582_v43  ;;  %v2178_v49 = vrot.slane %v2176_v31, 5  ;;  %v1604_v17 = vor.u32 %v1603_v34, %v1600_v20  ;;  %v4550_v42 = vrot.slane %v1607_v48, 5  ;;  %v4556_v43 = vld [vmem:[#allocation2 + $0x38] sm:$0xe]  ;;  %v4562_v29 = vld [vmem:[#allocation2 + $0x40] sm:$0xe] }
 0x27d   : > { %v2353_v62 = vsel %vm4218_vm14, %v3516_v54, %v2352_v53  ;;  %v4552_v52 = vunpack.c.l.b16 %v2165_v22  ;;  %v2357_v5 = vsel %vm4218_vm14, %v3517_v10, %v2356_v46  ;;  %v3518_v57 = vrot.slane %v2328_v16, 9  ;;  %2665 = vmatpush.bf16.msrb.mxu2 %v3728_v4  ;;  %v4576_v15 = vld [vmem:[#allocation2 + $0x38] sm:$0xf]  ;;  %v2332_v34 = vld [vmem:[#allocation2 + $0x40] sm:$0xe] }
 0x27e   : > { %v1679_v27 = vpack.c.b16 %v4527_v26, %v4525_v9  ;;  %v2399_v25 = vunpack.c.l.b16 %v2353_v62  ;;  %v2179_v58 = vsel %vm4248_vm1, %v2174_v38, %v2178_v49  ;;  %v2360_v63 = vrot.slane %v4455_v32, 5  ;;  %v3727_v32 = vld [vmem:[%s4844_s3 + $0x8] sm:$0xff]  ;;  %v2331_v24 = vld [vmem:[#allocation2 + $0x38] sm:$0xe] }
 0x27f   : > { %v4565_v55 = vrot.slane %v1621_v45, 5  ;;  %v2181_v1 = vshrl.u32 %v2092_v2, 16  ;;  %v2184_v61 = vshll.u32 %v2092_v2, 16  ;;  %v3519_v6 = vrot.slane %v2329_v51, 9  ;;  %v2333_v16 = vld [vmem:[#allocation2 + $0x48] sm:$0xe] }
 0x280   : > { %v4570_v50 = vrot.slane %v1604_v17, 4  ;;  %v2195_v9 = vshrl.u32 %v2094_v12, 16  ;;  %v2198_v11 = vshll.u32 %v2094_v12, 16  ;;  %v2230_v14 = vunpack.c.l.b16 %v2179_v58  ;;  %v2093_v48 = vld [vmem:[#allocation2 + $0x44] sm:$0x1] }
 0x281   : > { %v2364_v13 = vrot.slane %v4459_v36, 5  ;;  %v1821_v54 = vrot.slane %v4554_v56, 5  ;;  %v3355_v23 = vrot.slane %v4562_v29, 9  ;;  %v3520_v26 = vrot.slane %v2330_v0, 9  ;;  %v3715_v36 = vld [vmem:[%s4843_s2 + $0x208] sm:$0xff]  ;;  %2666 = vmatpush.bf16.msrb.mxu2 %v3727_v32 }
 0x282   : > { %1742 = vmatmul.bf16.vlgmr.msrb.gmra.mxu3 %v1678_v39  ;;  %v1614_v39 = vrot.slane %v1612_v19, 4  ;;  %v2361_v19 = vsel %vm4218_vm14, %v3518_v57, %v2360_v63  ;;  %v2183_v28 = vrot.slane %v2181_v1, 4  ;;  %v2186_v31 = vrot.slane %v2184_v61, 5  ;;  %v3696_v63 = vld [vmem:[#allocation2 + $0x34] sm:$0xf0] }
 0x283   : > { %v2365_v33 = vsel %vm4218_vm14, %v3519_v6, %v2364_v13  ;;  %v2401_v20 = vunpack.c.l.b16 %v2361_v19  ;;  %v2197_v53 = vrot.slane %v2195_v9, 4  ;;  %v2200_v22 = vrot.slane %v2198_v11, 5  ;;  %2469 = vmatpush.bf16.msra.mxu3 %v3715_v36 }
 0x284   : > { %1921 = vmatmul.bf16.gmra.mxu2 %v1853_v60  ;;  %v1618_v59 = vor.u32 %v1617_v40, %v1614_v39  ;;  %v2400_v60 = vunpack.c.l.b16 %v2357_v5  ;;  %v2402_v37 = vunpack.c.l.b16 %v2365_v33  ;;  %v2368_v47 = vrot.slane %v4501_v30, 5  ;;  %v2095_v39 = vld [vmem:[#allocation2 + $0x4c] sm:$0x1] }
 0x285   : > { %2302 = vmatmul.bf16.gmra.mxu0 %v2234_v8  ;;  %v3354_v8 = vrot.slane %v4556_v43, 9  ;;  %v2235_v10 = vpack.c.b16 %v2230_v14, %v4552_v52  ;;  %v1610_v38 = vsel %vm4248_vm1, %v4570_v50, %v4550_v42  ;;  %v1626_v40 = vshrl.u32 %v4576_v15, 16  ;;  %v1539_v42 = vld [vmem:[#allocation2 + $0x40] sm:$0xf]  ;;  %v1540_v52 = vld [vmem:[#allocation2 + $0x44] sm:$0x1] }
 0x286   : > { %v4578_v18 = vpack.c.b16 %v2400_v60, %v2399_v25  ;;  %v4583_v21 = vrot.slane %v1618_v59, 4  ;;  %v3521_v62 = vrot.slane %v2331_v24, 9  ;;  %v4602_v45 = vpack.c.b16 %v2402_v37, %v2401_v20  ;;  %v3430_v60 = vld [vmem:[#allocation2 + $0x30] sm:$0xf] }
 0x287   : > { %v2369_v30 = vsel %vm4218_vm14, %v3520_v26, %v2368_v47  ;;  %v2372_v46 = vrot.slane %v4517_v35, 5  ;;  %v2187_v49 = vor.u32 %v2186_v31, %v2183_v28  ;;  %v2204_v17 = vshll.u32 %v2095_v39, 16 }
 0x288   : > { %v2403_v2 = vunpack.c.l.b16 %v2369_v30  ;;  %v2376_v51 = vrot.slane %v2093_v48, 5  ;;  %v2201_v12 = vor.u32 %v2200_v22, %v2197_v53  ;;  %v3523_v25 = vrot.slane %v2333_v16, 9  ;;  %v3697_v30 = vld [vmem:[#allocation2 + $0x44] sm:$0xf0] }
 0x289   : > { %v2373_v5 = vsel %vm4218_vm14, %v3521_v62, %v2372_v46  ;;  %v2380_v57 = vrot.slane %v2095_v39, 5  ;;  %v1624_v35 = vsel %vm4248_vm1, %v4583_v21, %v4565_v55  ;;  %v1629_v58 = vshll.u32 %v4576_v15, 16  ;;  %v3714_v15 = vld [vmem:[%s4843_s2 + $0x200] sm:$0xff] }
 0x28a   : > { %v2404_v59 = vunpack.c.l.b16 %v2373_v5  ;;  %v2190_v0 = vshll.u32 %v2093_v48, 16  ;;  %v1640_v1 = vshrl.u32 %v1539_v42, 16  ;;  %v1825_v6 = vrot.slane %v1540_v52, 5  ;;  %2470 = vmatpush.bf16.msra.mxu3 %v3714_v15  ;;  %v3723_v5 = vld [vmem:[%s3933_s11 + $0x8] sm:$0xff] }
 0x28b   : > { %2056 = vmatmul.bf16.gmra.mxu1 %v3427_v41  ;;  %v3726_v41 = vld [vmem:[%s4844_s3] sm:$0xff]  ;;  %v2381_v61 = vsel %vm4218_vm14, %v3523_v25, %v2380_v57  ;;  %v1643_v50 = vshll.u32 %v1539_v42, 16  ;;  %v2188_v11 = vrot.slane %v2187_v49, 4  ;;  %v2202_v14 = vrot.slane %v2201_v12, 4 }
 0x28c   : > { %2667 = vmatpush.bf16.msrb.mxu2 %v3726_v41  ;;  %v4619_v9 = vpack.c.b16 %v2404_v59, %v2403_v2  ;;  %v2406_v55 = vunpack.c.l.b16 %v2381_v61  ;;  %v2206_v32 = vrot.slane %v2204_v17, 5  ;;  %v3431_v19 = vor.u32 %v3696_v63, %v3430_v60  ;;  %v3434_v41 = vld [vmem:[#allocation2 + $0x40] sm:$0xf] }
 0x28d   : > { %v1822_v13 = vsel %vm4218_vm14, %v3354_v8, %v1821_v54  ;;  %v1674_v24 = vunpack.c.l.b16 %v1610_v38  ;;  %v1675_v26 = vunpack.c.l.b16 %v1624_v35  ;;  %v2192_v28 = vrot.slane %v2190_v0, 5  ;;  %v3722_v2 = vld [vmem:[%s3933_s11] sm:$0xff] }
 0x28e   : > { %v1628_v31 = vrot.slane %v1626_v40, 4  ;;  %v1826_v33 = vsel %vm4218_vm14, %v3355_v23, %v1825_v6  ;;  %v1631_v20 = vrot.slane %v1629_v58, 5  ;;  %v1645_v48 = vrot.slane %v1643_v50, 5 }
 0x28f   : > { %v2193_v43 = vsel %vm4248_vm1, %v2188_v11, %v2192_v28  ;;  %v2207_v8 = vsel %vm4248_vm1, %v2202_v14, %v2206_v32  ;;  %v1680_v54 = vpack.c.b16 %v1675_v26, %v1674_v24  ;;  %v1850_v53 = vunpack.c.l.b16 %v1822_v13 }
 0x290   : > { %v1851_v22 = vunpack.c.l.b16 %v1826_v33  ;;  %v2231_v36 = vunpack.c.l.b16 %v2193_v43  ;;  %v2232_v37 = vunpack.c.l.b16 %v2207_v8  ;;  %v1632_v47 = vor.u32 %v1631_v20, %v1628_v31 }
 0x291   : > { %v1635_v7 = vshll.u32 %v4554_v56, 16  ;;  %v1649_v29 = vshll.u32 %v1540_v52, 16  ;;  %v3435_v56 = vor.u32 %v3697_v30, %v3434_v41 }
 0x292   : > { %1747 = vmatmul.bf16.gmra.mxu3 %v1679_v27  ;;  %v3522_v27 = vrot.slane %v2332_v34, 9  ;;  %v1642_v34 = vrot.slane %v1640_v1, 4  ;;  %v1855_v23 = vpack.c.b16 %v1851_v22, %v1850_v53  ;;  %v2236_v38 = vpack.c.b16 %v2232_v37, %v2231_v36  ;;  %v3724_v1 = vld [vmem:[%s3933_s11 + $0x10] sm:$0xff] }
 0x293   : > { %v1633_v39 = vrot.slane %v1632_v47, 4  ;;  %v1637_v62 = vrot.slane %v1635_v7, 5  ;;  %v1651_v16 = vrot.slane %v1649_v29, 5 }
 0x294   : > { %1926 = vmatmul.bf16.gmra.mxu2 %v4544_v44  ;;  %v2377_v44 = vsel %vm4218_vm14, %v3522_v27, %v2376_v51 }
 0x295   : > { %2307 = vmatmul.bf16.gmra.mxu0 %v2235_v10  ;;  %v2405_v4 = vunpack.c.l.b16 %v2377_v44  ;;  %v1646_v10 = vor.u32 %v1645_v48, %v1642_v34  ;;  %v1638_v46 = vsel %vm4248_vm1, %v1633_v39, %v1637_v62 }
 0x296   : > { %v1676_v49 = vunpack.c.l.b16 %v1638_v46 }
 0x297   : > { %v4628_v21 = vpack.c.b16 %v2406_v55, %v2405_v4  ;;  %v1647_v40 = vrot.slane %v1646_v10, 4 }
 0x299   : > { %v1652_v27 = vsel %vm4248_vm1, %v1647_v40, %v1651_v16 }
 0x29a   : > { %v1677_v17 = vunpack.c.l.b16 %v1652_v27 }
 0x29b   : > { %2061 = vmatmul.bf16.gmra.mxu1 %v3431_v19  ;;  %v3725_v19 = vld [vmem:[%s3933_s11 + $0x18] sm:$0xff] }
 0x29c   : > { %v1681_v42 = vpack.c.b16 %v1677_v17, %v1676_v49 }
 0x2a2   : > { %1752 = vmatmul.bf16.gmra.mxu3 %v1680_v54 }
 0x2a4   : > { %1931 = vmatmul.bf16.gmra.mxu2 %v1855_v23 }
 0x2a5   : > { %2312 = vmatmul.bf16.gmra.mxu0 %v2236_v38 }
 0x2ab   : > { %2066 = vmatmul.bf16.gmra.mxu1 %v3435_v56 }
 0x2b2   : > { %1757 = vmatmul.bf16.gmra.mxu3 %v1681_v42  ;;  %v1497_v6 = vpop.f32.mrf.mxu0 }
 0x2b4   : > { %2668 = vmatmul.bf16.vlgmr.msrb.gmra.mxu2 %v3722_v2 }
 0x2b7   : > { %v1194_v51 = vpop.f32.mrf.mxu2 }
 0x2b8   : > { %v1363_v52 = vpop.f32.mrf.mxu1 }
 0x2ba   : > { %v1499_v13 = vpop.f32.mrf.mxu0 }
 0x2bf   : > { %v1196_v12 = vpop.f32.mrf.mxu2 }
 0x2c0   : > { %v1365_v3 = vpop.f32.mrf.mxu1 }
 0x2c2   : > { %2471 = vmatmul.bf16.vlgmr.msra.gmra.mxu3 %v4578_v18  ;;  %v1502_v34 = vpop.f32.mrf.mxu0 }
 0x2c4   : > { %2673 = vmatmul.bf16.gmra.mxu2 %v3723_v5 }
 0x2c5   : > { %v1093_v25 = vpop.f32.mrf.mxu3 }
 0x2c6   : > { %v1195_v57 = vadd.f32 %v1194_v51, %v1093_v25 }
 0x2c7   : > { %v1199_v58 = vpop.f32.mrf.mxu2 }
 0x2c8   : > { %v1383_v35 = vadd.f32 %v1363_v52, %v1195_v57  ;;  %v1368_v63 = vpop.f32.mrf.mxu1 }
 0x2ca   : > { %v1517_v24 = vadd.f32 %v1497_v6, %v1383_v35  ;;  %v1504_v37 = vpop.f32.mrf.mxu0 }
 0x2cd   : > { %v1095_v59 = vpop.f32.mrf.mxu3 }
 0x2ce   : > { %v1197_v44 = vadd.f32 %v1196_v12, %v1095_v59 }
 0x2cf   : > { %v1201_v0 = vpop.f32.mrf.mxu2 }
 0x2d0   : > { %v1384_v60 = vadd.f32 %v1365_v3, %v1197_v44  ;;  %v1370_v55 = vpop.f32.mrf.mxu1 }
 0x2d2   : > { %2476 = vmatmul.bf16.gmra.mxu3 %v4602_v45  ;;  %v1518_v20 = vadd.f32 %v1499_v13, %v1384_v60  ;;  %v1507_v23 = vpop.f32.mrf.mxu0 }
 0x2d4   : > { %2678 = vmatmul.bf16.gmra.mxu2 %v3724_v1 }
 0x2d5   : > { %v1098_v61 = vpop.f32.mrf.mxu3 }
 0x2d6   : > { %v1200_v4 = vadd.f32 %v1199_v58, %v1098_v61 }
 0x2d7   : > { %v1204_v50 = vpop.f32.mrf.mxu2 }
 0x2d8   : > { %v1385_v18 = vadd.f32 %v1368_v63, %v1200_v4  ;;  %v1373_v26 = vpop.f32.mrf.mxu1 }
 0x2da   : > { %v1519_v22 = vadd.f32 %v1502_v34, %v1385_v18  ;;  %v1509_v30 = vpop.f32.mrf.mxu0 }
 0x2dd   : > { %v1100_v11 = vpop.f32.mrf.mxu3 }
 0x2de   : > { %v1202_v14 = vadd.f32 %v1201_v0, %v1100_v11 }
 0x2df   : > { %v1206_v15 = vpop.f32.mrf.mxu2 }
 0x2e0   : > { %v1386_v32 = vadd.f32 %v1370_v55, %v1202_v14  ;;  %v1375_v8 = vpop.f32.mrf.mxu1 }
 0x2e2   : > { %2481 = vmatmul.bf16.gmra.mxu3 %v4619_v9  ;;  %v1520_v10 = vadd.f32 %v1504_v37, %v1386_v32  ;;  %v1512_v57 = vpop.f32.mrf.mxu0  ;;  %v2740_v32 = vld [vmem:[%s4848_s7 + $0x78] sm:$0xff] }
 0x2e3   : > { %2741 = vmatpush.msrb.mxu1 %v2740_v32  ;;  %2815 = vmatpush.msrb.mxu0 %v2740_v32 }
 0x2e4   : > { %2683 = vmatmul.bf16.gmra.mxu2 %v3725_v19 }
 0x2e5   : > { %v1103_v28 = vpop.f32.mrf.mxu3 }
 0x2e6   : > { %v1205_v45 = vadd.f32 %v1204_v50, %v1103_v28  ;;  %v2739_v28 = vld [vmem:[%s4848_s7 + $0x70] sm:$0xff] }
 0x2e7   : > { %v1209_v33 = vpop.f32.mrf.mxu2  ;;  %2742 = vmatpush.msrb.mxu1 %v2739_v28  ;;  %2816 = vmatpush.msrb.mxu0 %v2739_v28 }
 0x2e8   : > { %v1387_v31 = vadd.f32 %v1373_v26, %v1205_v45  ;;  %v1378_v52 = vpop.f32.mrf.mxu1 }
 0x2ea   : > { %v1521_v39 = vadd.f32 %v1507_v23, %v1387_v31  ;;  %v1514_v63 = vpop.f32.mrf.mxu0  ;;  %v2735_v23 = vld [vmem:[%s4848_s7 + $0x50] sm:$0xff] }
 0x2ed   : > { %v1105_v48 = vpop.f32.mrf.mxu3 }
 0x2ee   : > { %v1207_v43 = vadd.f32 %v1206_v15, %v1105_v48 }
 0x2ef   : > { %v1211_v53 = vpop.f32.mrf.mxu2 }
 0x2f0   : > { %v1388_v54 = vadd.f32 %v1375_v8, %v1207_v43  ;;  %v1380_v59 = vpop.f32.mrf.mxu1  ;;  %v2737_v8 = vld [vmem:[%s4848_s7 + $0x60] sm:$0xff] }
 0x2f2   : > { %2486 = vmatmul.bf16.gmra.mxu3 %v4628_v21  ;;  %v1522_v46 = vadd.f32 %v1509_v30, %v1388_v54  ;;  %v2298_v55 = vpop.f32.mrf.mxu0 }
 0x2f5   : > { %v1108_v9 = vpop.f32.mrf.mxu3 }
 0x2f6   : > { %v1210_v36 = vadd.f32 %v1209_v33, %v1108_v9  ;;  %v2738_v33 = vld [vmem:[%s4848_s7 + $0x68] sm:$0xff] }
 0x2f7   : > { %v1917_v47 = vpop.f32.mrf.mxu2  ;;  %2743 = vmatpush.msrb.mxu1 %v2738_v33  ;;  %2817 = vmatpush.msrb.mxu0 %v2738_v33 }
 0x2f8   : > { %v1389_v61 = vadd.f32 %v1378_v52, %v1210_v36  ;;  %v2052_v18 = vpop.f32.mrf.mxu1  ;;  %v2733_v52 = vld [vmem:[%s4848_s7 + $0x40] sm:$0xff] }
 0x2f9   : > { %2744 = vmatpush.msrb.mxu1 %v2737_v8  ;;  %2818 = vmatpush.msrb.mxu0 %v2737_v8 }
 0x2fa   : > { %v1523_v50 = vadd.f32 %v1512_v57, %v1389_v61 }
 0x2fd   : > { %v1110_v7 = vpop.f32.mrf.mxu3 }
 0x2fe   : > { %v1212_v29 = vadd.f32 %v1211_v53, %v1110_v7  ;;  %v4683_v7 = vld [vmem:[%s4846_s5] ss:$0 sm:$0xff] }
 0x2ff   : > { %v1919_v38 = vpop.f32.mrf.mxu2 }
 0x300   : > { %v1390_v15 = vadd.f32 %v1380_v59, %v1212_v29 }
 0x302   : > { %v1524_v26 = vadd.f32 %v1514_v63, %v1390_v15 }
 0x305   : > { %v1743_v40 = vpop.f32.mrf.mxu3 }
 0x306   : > { %v1763_v62 = vadd.f32 %v1743_v40, %v1517_v24  ;;  %v2054_v24 = vpop.f32.mrf.mxu1 }
 0x307   : > { %v1922_v41 = vpop.f32.mrf.mxu2 }
 0x308   : > { %v1937_v16 = vadd.f32 %v1917_v47, %v1763_v62  ;;  %v2734_v62 = vld [vmem:[%s4848_s7 + $0x48] sm:$0xff] }
 0x30a   : > { %v2072_v43 = vadd.f32 %v2052_v18, %v1937_v16 }
 0x30c   : > { %v2318_v9 = vadd.f32 %v2298_v55, %v2072_v43 }
 0x30d   : > { %v1745_v27 = vpop.f32.mrf.mxu3 }
 0x30e   : > { %v1764_v56 = vadd.f32 %v1745_v27, %v1518_v20  ;;  %v2300_v20 = vpop.f32.mrf.mxu0  ;;  %v2057_v54 = vpop.f32.mrf.mxu1 }
 0x30f   : > { %v1924_v49 = vpop.f32.mrf.mxu2 }
 0x310   : > { %v1938_v21 = vadd.f32 %v1919_v38, %v1764_v56 }
 0x312   : > { %v2073_v36 = vadd.f32 %v2054_v24, %v1938_v21 }
 0x314   : > { %v2319_v29 = vadd.f32 %v2300_v20, %v2073_v36 }
 0x315   : > { %v1748_v17 = vpop.f32.mrf.mxu3 }
 0x316   : > { %v1765_v42 = vadd.f32 %v1748_v17, %v1519_v22  ;;  %v2736_v22 = vld [vmem:[%s4848_s7 + $0x58] sm:$0xff]  ;;  %v2303_v37 = vpop.f32.mrf.mxu0  ;;  %v2059_v16 = vpop.f32.mrf.mxu1 }
 0x317   : > { %v1927_v51 = vpop.f32.mrf.mxu2  ;;  %2745 = vmatpush.msrb.mxu1 %v2736_v22  ;;  %2819 = vmatpush.msrb.mxu0 %v2736_v22 }
 0x318   : > { %v4651_v2 = vadd.f32 %v1922_v41, %v1765_v42 }
 0x319   : > { %2746 = vmatpush.msrb.mxu1 %v2735_v23  ;;  %2820 = vmatpush.msrb.mxu0 %v2735_v23 }
 0x31a   : > { %v2074_v30 = vadd.f32 %v2057_v54, %v4651_v2 }
 0x31b   : > { %2747 = vmatpush.msrb.mxu1 %v2734_v62  ;;  %2821 = vmatpush.msrb.mxu0 %v2734_v62 }
 0x31d   : > { %v1750_v12 = vpop.f32.mrf.mxu3  ;;  %2748 = vmatpush.msrb.mxu1 %v2733_v52  ;;  %2822 = vmatpush.msrb.mxu0 %v2733_v52 }
 0x31e   : > { %v1766_v5 = vadd.f32 %v1750_v12, %v1520_v10  ;;  %v2305_v17 = vpop.f32.mrf.mxu0 }
 0x31f   : > { %v1929_v3 = vpop.f32.mrf.mxu2 }
 0x320   : > { %v4653_v25 = vadd.f32 %v1924_v49, %v1766_v5 }
 0x322   : > { %v2075_v2 = vadd.f32 %v2059_v16, %v4653_v25 }
 0x325   : > { %v1753_v35 = vpop.f32.mrf.mxu3 }
 0x326   : > { %v1767_v58 = vadd.f32 %v1753_v35, %v1521_v39  ;;  %v4704_v35 = vld [vmem:[%s4847_s6] ss:$0 sm:$0xff] }
 0x327   : > { %v1932_v60 = vpop.f32.mrf.mxu2 }
 0x328   : > { %v4655_v44 = vadd.f32 %v1927_v51, %v1767_v58  ;;  %v2320_v51 = vadd.f32 %v2303_v37, %v2074_v30 }
 0x32d   : > { %v1755_v0 = vpop.f32.mrf.mxu3 }
 0x32e   : > { %v1768_v1 = vadd.f32 %v1755_v0, %v1522_v46  ;;  %v2321_v0 = vadd.f32 %v2305_v17, %v2075_v2 }
 0x32f   : > { %v1934_v6 = vpop.f32.mrf.mxu2 }
 0x330   : > { %v4657_v4 = vadd.f32 %v1929_v3, %v1768_v1  ;;  %v2062_v3 = vpop.f32.mrf.mxu1  ;;  %v2308_v1 = vpop.f32.mrf.mxu0 }
 0x335   : > { %v1758_v11 = vpop.f32.mrf.mxu3 }
 0x336   : > { %v1769_v14 = vadd.f32 %v1758_v11, %v1523_v50  ;;  %v2732_v50 = vld [vmem:[%s4848_s7 + $0x38] sm:$0xff]  ;;  %v2076_v11 = vadd.f32 %v2062_v3, %v4655_v44 }
 0x337   : > { %v4664_v13 = vpop.f32.mrf.mxu2  ;;  %2749 = vmatpush.msrb.mxu1 %v2732_v50  ;;  %2823 = vmatpush.msrb.mxu0 %v2732_v50 }
 0x338   : > { %v4662_v19 = vadd.f32 %v1932_v60, %v1769_v14  ;;  %v4708_v61 = vadd.f32 %v4704_v35, %v4664_v13  ;;  %v2731_v14 = vld [vmem:[%s4848_s7 + $0x30] sm:$0xff]  ;;  %v2310_v22 = vpop.f32.mrf.mxu0 }
 0x339   : > { %2750 = vmatpush.msrb.mxu1 %v2731_v14  ;;  %2824 = vmatpush.msrb.mxu0 %v2731_v14 }
 0x33a   : > { %v2702_v32 = vmul.f32 %v4708_v61, %v4708_v61 }
 0x33d   : > { %v1760_v45 = vpop.f32.mrf.mxu3 }
 0x33e   : > { %v1770_v31 = vadd.f32 %v1760_v45, %v1524_v26  ;;  %v2730_v45 = vld [vmem:[%s4848_s7 + $0x28] sm:$0xff] }
 0x33f   : > { %v2671_v48 = vpop.f32.mrf.mxu2  ;;  %2751 = vmatpush.msrb.mxu1 %v2730_v45  ;;  %2825 = vmatpush.msrb.mxu0 %v2730_v45 }
 0x340   : > { %v4672_v34 = vadd.f32 %v1934_v6, %v1770_v31  ;;  %v4711_v18 = vadd.f32 %v4704_v35, %v2671_v48  ;;  %v2064_v31 = vpop.f32.mrf.mxu1  ;;  %v2322_v48 = vadd.f32 %v2308_v1, %v2076_v11 }
 0x342   : > { %v2703_v15 = vmul.f32 %v4711_v18, %v4711_v18  ;;  %v2689_v33 = vadd.f32 %v4711_v18, %v4708_v61 }
 0x344   : > { %v2710_v8 = vadd.f32 %v2703_v15, %v2702_v32 }
 0x345   : > { %v2472_v53 = vpop.f32.mrf.mxu3 }
 0x346   : > { %v2492_v10 = vadd.f32 %v2472_v53, %v2318_v9 }
 0x347   : > { %v2674_v47 = vpop.f32.mrf.mxu2 }
 0x348   : > { %v2502_v39 = vadd.f32 %v4683_v7, %v2492_v10  ;;  %v4726_v24 = vadd.f32 %v4704_v35, %v2674_v47  ;;  %v2077_v47 = vadd.f32 %v2064_v31, %v4657_v4  ;;  %v2729_v10 = vld [vmem:[%s4848_s7 + $0x20] sm:$0xff]  ;;  %v2727_v4 = vld [vmem:[%s4848_s7 + $0x10] sm:$0xff] }
 0x349   : > { %2826 = vmatpush.msrb.mxu0 %v2729_v10  ;;  %2752 = vmatpush.msrb.mxu1 %v2729_v10 }
 0x34a   : > { %v2539_v27 = vmul.f32 %v2502_v39, %v2502_v39  ;;  %v2704_v54 = vmul.f32 %v4726_v24, %v4726_v24  ;;  %v2690_v9 = vadd.f32 %v2689_v33, %v4726_v24 }
 0x34d   : > { %v2474_v38 = vpop.f32.mrf.mxu3 }
 0x34e   : > { %v2493_v40 = vadd.f32 %v2474_v38, %v2319_v29  ;;  %v2728_v29 = vld [vmem:[%s4848_s7 + $0x18] sm:$0xff] }
 0x34f   : > { %v2676_v46 = vpop.f32.mrf.mxu2  ;;  %2827 = vmatpush.msrb.mxu0 %v2728_v29  ;;  %2753 = vmatpush.msrb.mxu1 %v2728_v29 }
 0x350   : > { %v2503_v41 = vadd.f32 %v4683_v7, %v2493_v40  ;;  %v4739_v36 = vadd.f32 %v4704_v35, %v2676_v46 }
 0x351   : > { %2828 = vmatpush.msrb.mxu0 %v2727_v4  ;;  %2754 = vmatpush.msrb.mxu1 %v2727_v4 }
 0x352   : > { %v4694_v56 = vpack.c.bf16 %v2503_v41, %v2502_v39  ;;  %v2526_v21 = vadd.f32 %v2503_v41, %v2502_v39  ;;  %v2540_v49 = vmul.f32 %v2503_v41, %v2503_v41  ;;  %v2711_v39 = vadd.f32 %v2710_v8, %v2704_v54 }
 0x353   : > { %v2691_v16 = vadd.f32 %v2690_v9, %v4739_v36  ;;  %v2705_v41 = vmul.f32 %v4739_v36, %v4739_v36 }
 0x354   : > { %v2547_v42 = vadd.f32 %v2540_v49, %v2539_v27  ;;  %v2323_v27 = vadd.f32 %v2310_v22, %v2077_v47  ;;  %v2067_v49 = vpop.f32.mrf.mxu1 }
 0x355   : > { %v2477_v12 = vpop.f32.mrf.mxu3 }
 0x356   : > { %v2494_v5 = vadd.f32 %v2477_v12, %v2320_v51 }
 0x357   : > { %v2679_v58 = vpop.f32.mrf.mxu2 }
 0x358   : > { %v2504_v57 = vadd.f32 %v4683_v7, %v2494_v5  ;;  %v4750_v23 = vadd.f32 %v4704_v35, %v2679_v58  ;;  %v2725_v5 = vld [vmem:[%s4848_s7] sm:$0xff] }
 0x35a   : > { %v2527_v59 = vadd.f32 %v2526_v21, %v2504_v57  ;;  %v2541_v60 = vmul.f32 %v2504_v57, %v2504_v57  ;;  %v2726_v21 = vld [vmem:[%s4848_s7 + $0x8] sm:$0xff]  ;;  %v2692_v17 = vadd.f32 %v2691_v16, %v4750_v23 }
 0x35b   : > { %2829 = vmatpush.msrb.mxu0 %v2726_v21  ;;  %2755 = vmatpush.msrb.mxu1 %v2726_v21 }
 0x35c   : > { %v2548_v63 = vadd.f32 %v2547_v42, %v2541_v60  ;;  %v2706_v42 = vmul.f32 %v4750_v23, %v4750_v23  ;;  %v2313_v60 = vpop.f32.mrf.mxu0  ;;  %v2069_v33 = vpop.f32.mrf.mxu1 }
 0x35d   : > { %v2479_v25 = vpop.f32.mrf.mxu3  ;;  %2830 = vmatpush.msrb.mxu0 %v2725_v5  ;;  %2756 = vmatpush.msrb.mxu1 %v2725_v5 }
 0x35e   : > { %v2495_v6 = vadd.f32 %v2479_v25, %v2321_v0 }
 0x35f   : > { %v2681_v13 = vpop.f32.mrf.mxu2 }
 0x360   : > { %v2505_v55 = vadd.f32 %v4683_v7, %v2495_v6  ;;  %v4759_v30 = vadd.f32 %v4704_v35, %v2681_v13 }
 0x362   : > { %v4728_v26 = vpack.c.bf16 %v2505_v55, %v2504_v57  ;;  %v2528_v28 = vadd.f32 %v2527_v59, %v2505_v55  ;;  %v2542_v44 = vmul.f32 %v2505_v55, %v2505_v55  ;;  %v2712_v57 = vadd.f32 %v2711_v39, %v2705_v41 }
 0x363   : > { %v2693_v2 = vadd.f32 %v2692_v17, %v4759_v30  ;;  %v2707_v3 = vmul.f32 %v4759_v30, %v4759_v30  ;;  %v2078_v59 = vadd.f32 %v2067_v49, %v4662_v19 }
 0x364   : > { %v2549_v20 = vadd.f32 %v2548_v63, %v2542_v44  ;;  %v2713_v63 = vadd.f32 %v2712_v57, %v2706_v42  ;;  %v2315_v9 = vpop.f32.mrf.mxu0 }
 0x365   : > { %v2482_v43 = vpop.f32.mrf.mxu3  ;;  %v2324_v15 = vadd.f32 %v2313_v60, %v2078_v59 }
 0x366   : > { %v2496_v53 = vadd.f32 %v2482_v43, %v2322_v48  ;;  %v2714_v14 = vadd.f32 %v2713_v63, %v2707_v3 }
 0x367   : > { %v2684_v38 = vpop.f32.mrf.mxu2 }
 0x368   : > { %v2506_v37 = vadd.f32 %v4683_v7, %v2496_v53  ;;  %v4768_v51 = vadd.f32 %v4704_v35, %v2684_v38 }
 0x36a   : > { %v2529_v40 = vadd.f32 %v2528_v28, %v2506_v37  ;;  %v2543_v62 = vmul.f32 %v2506_v37, %v2506_v37  ;;  %v2694_v0 = vadd.f32 %v2693_v2, %v4768_v51  ;;  %v2708_v1 = vmul.f32 %v4768_v51, %v4768_v51 }
 0x36c   : > { %v2550_v46 = vadd.f32 %v2549_v20, %v2543_v62  ;;  %v2715_v13 = vadd.f32 %v2714_v14, %v2708_v1 }
 0x36d   : > { %v2484_v52 = vpop.f32.mrf.mxu3 }
 0x36e   : > { %v2497_v12 = vadd.f32 %v2484_v52, %v2323_v27 }
 0x36f   : > { %v2686_v25 = vpop.f32.mrf.mxu2 }
 0x370   : > { %v2507_v58 = vadd.f32 %v4683_v7, %v2497_v12  ;;  %v4784_v11 = vadd.f32 %v4704_v35, %v2686_v25  ;;  %v2079_v35 = vadd.f32 %v2069_v33, %v4672_v34 }
 0x372   : > { %v4781_v6 = vpack.c.bf16 %v2507_v58, %v2506_v37  ;;  %v2530_v50 = vadd.f32 %v2529_v40, %v2507_v58  ;;  %v2544_v55 = vmul.f32 %v2507_v58, %v2507_v58  ;;  %v2695_v19 = vadd.f32 %v2694_v0, %v4784_v11 }
 0x373   : > { %v2709_v28 = vmul.f32 %v4784_v11, %v4784_v11  ;;  %v2325_v29 = vadd.f32 %v2315_v9, %v2079_v35 }
 0x374   : > { %v2551_v32 = vadd.f32 %v2550_v46, %v2544_v55  ;;  %v2696_v45 = vrot.slane %v2695_v19, 4 }
 0x375   : > { %v2487_v44 = vpop.f32.mrf.mxu3  ;;  %v2716_v20 = vadd.f32 %v2715_v13, %v2709_v28 }
 0x376   : > { %v2498_v31 = vadd.f32 %v2487_v44, %v2324_v15  ;;  %v2697_v48 = vadd.f32 %v2696_v45, %v2695_v19  ;;  %v2780_v19 = vld [vmem:[%s4849_s8 + $0x8] sm:$0xff]  ;;  %v2779_v15 = vld [vmem:[%s4849_s8] sm:$0xff] }
 0x377   : > { %v2717_v8 = vrot.slane %v2716_v20, 4  ;;  %2798 = vmatpush.msra.mxu1 %v2780_v19 }
 0x378   : > { %v2508_v43 = vadd.f32 %v4683_v7, %v2498_v31  ;;  %v2698_v54 = vrot.slane %v2697_v48, 2 }
 0x379   : > { %v2718_v37 = vadd.f32 %v2717_v8, %v2716_v20  ;;  %2799 = vmatpush.msra.mxu1 %v2779_v15 }
 0x37a   : > { %v2531_v53 = vadd.f32 %v2530_v50, %v2508_v43  ;;  %v2545_v22 = vmul.f32 %v2508_v43, %v2508_v43  ;;  %v2699_v47 = vadd.f32 %v2698_v54, %v2697_v48 }
 0x37b   : > { %v2719_v38 = vrot.slane %v2718_v37, 2 }
 0x37c   : > { %v2552_v10 = vadd.f32 %v2551_v32, %v2545_v22  ;;  %v2700_v62 = vrot.slane %v2699_v47, 1 }
 0x37d   : > { %v2489_v39 = vpop.f32.mrf.mxu3  ;;  %v2720_v4 = vadd.f32 %v2719_v38, %v2718_v37 }
 0x37e   : > { %v2499_v40 = vadd.f32 %v2489_v39, %v2325_v29  ;;  %v2701_v21 = vadd.f32 %v2700_v62, %v2699_v47 }
 0x37f   : > { %v2721_v41 = vrot.slane %v2720_v4, 1 }
 0x380   : > { %v2509_v16 = vadd.f32 %v4683_v7, %v2499_v40 }
 0x381   : > { %v2722_v49 = vadd.f32 %v2721_v41, %v2720_v4  ;;  %v2804_v4 = vld [vmem:[%s4846_s5 + $0x1] sm:$0x1] }
 0x382   : > { %v4792_v46 = vpack.c.bf16 %v2509_v16, %v2508_v43  ;;  %v2532_v34 = vadd.f32 %v2531_v53, %v2509_v16  ;;  %v2546_v27 = vmul.f32 %v2509_v16, %v2509_v16  ;;  %v2806_v16 = vrot.slane %v2804_v4, 7 }
 0x383   : > { %v2723_v52 = vsel %vm339_vm0, %v2701_v21, %v2722_v49  ;;  %v2809_v21 = vld [vmem:[%s4846_s5 + $0x2] sm:$0x1]  ;;  %v2876_v49 = vld [vmem:[%s4847_s6 + $0x1] sm:$0x1] }
 0x384   : > { %v2533_v17 = vrot.slane %v2532_v34, 4  ;;  %v2553_v42 = vadd.f32 %v2552_v10, %v2546_v27  ;;  %2831 = vmatmul.f32.vlgmr.msrb.gmra.mxu0 %v2723_v52  ;;  %v2878_v52 = vrot.slane %v2876_v49, 7 }
 0x386   : > { %v2534_v12 = vadd.f32 %v2533_v17, %v2532_v34  ;;  %v2554_v5 = vrot.slane %v2553_v42, 4 }
 0x388   : > { %v2535_v57 = vrot.slane %v2534_v12, 2  ;;  %v2555_v2 = vadd.f32 %v2554_v5, %v2553_v42 }
 0x38a   : > { %v2536_v3 = vadd.f32 %v2535_v57, %v2534_v12  ;;  %v2556_v58 = vrot.slane %v2555_v2, 2  ;;  %v3792_v57 = vunpack.c.l.bf16 %v4694_v56 }
 0x38c   : > { %v2537_v59 = vrot.slane %v2536_v3, 1  ;;  %v2557_v7 = vadd.f32 %v2556_v58, %v2555_v2  ;;  %v3793_v2 = vunpack.c.h.bf16 %v4694_v56  ;;  %v3796_v58 = vunpack.c.l.bf16 %v4728_v26 }
 0x38e   : > { %v2558_v60 = vrot.slane %v2557_v7, 1  ;;  %v2538_v63 = vadd.f32 %v2537_v59, %v2536_v3  ;;  %v3797_v59 = vunpack.c.h.bf16 %v4728_v26 }
 0x390   : > { %v2559_v0 = vadd.f32 %v2558_v60, %v2557_v7  ;;  %v3800_v7 = vunpack.c.l.bf16 %v4781_v6 }
 0x392   : > { %v2560_v1 = vsel %vm339_vm0, %v2538_v63, %v2559_v0  ;;  %v3801_v63 = vunpack.c.h.bf16 %v4781_v6  ;;  %v3804_v0 = vunpack.c.l.bf16 %v4792_v46 }
 0x393   : > { %2757 = vmatmul.f32.vlgmr.msrb.gmra.mxu1 %v2560_v1  ;;  %v3805_v1 = vunpack.c.h.bf16 %v4792_v46  ;;  %v2881_v46 = vld [vmem:[%s4847_s6 + $0x2] sm:$0x1] }
 0x394   : > { %2870 = vmatpush.msrb.mxu1 %v2780_v19 }
 0x396   : > { %2871 = vmatpush.msrb.mxu1 %v2779_v15 }
 0x401   : > { %v2832_v25 = vpop.f32.mrf.mxu0 }
 0x402   : > { %v2835_v50 = vmul.f32 0.001953125, %v2832_v25 }
 0x404   : > { %v2836_v55 = vmul.f32 %v2835_v50, %v2835_v50 }
 0x406   : > { %v2838_v14 = vrot.slane %v2836_v55, 7 }
 0x408   : > { %v2840_v32 = vsub.f32 %v2835_v50, %v2838_v14 }
 0x40a   : > { %v2841_v28 = vadd.f32 1e-05, %v2840_v32 }
 0x40c   : > { %3832 = vrsqrt.f32 %v2841_v28  ;;  %vm2848_vm7 = vweird.f32 %v2841_v28 }
 0x410   : > { %v2758_v13 = vpop.f32.mrf.mxu1 }
 0x411   : > { %v2761_v44 = vmul.f32 0.001953125, %v2758_v13 }
 0x412   : > { %v3833_v48 = vpop.eup %3832 }
 0x413   : > { %v2762_v45 = vmul.f32 %v2761_v44, %v2761_v44  ;;  %v2843_v43 = vmul.f32 %v3833_v48, %v2841_v28  ;;  %vm2849_vm6 = vweird.f32 %v3833_v48 }
 0x414   : > { %vm2850_vm8 = vmor %vm2848_vm7, %vm2849_vm6 }
 0x415   : > { %v2764_v31 = vrot.slane %v2762_v45, 7  ;;  %v2844_v8 = vmul.f32 %v3833_v48, %v2843_v43 }
 0x417   : > { %v2766_v33 = vsub.f32 %v2761_v44, %v2764_v31  ;;  %v2845_v22 = vmul.f32 0.5, %v2844_v8 }
 0x419   : > { %v2767_v20 = vadd.f32 1e-05, %v2766_v33  ;;  %v2846_v47 = vsub.f32 1.5, %v2845_v22 }
 0x41b   : > { %3834 = vrsqrt.f32 %v2767_v20  ;;  %vm2774_vm3 = vweird.f32 %v2767_v20  ;;  %v2847_v39 = vmul.f32 %v3833_v48, %v2846_v47 }
 0x41d   : > { %v2851_v40 = vsel %vm2850_vm8, %v3833_v48, %v2847_v39 }
 0x41e   : > { %v2852_v62 = vsel %vm339_vm0, %v2835_v50, %v2851_v40 }
 0x421   : > { %v3835_v35 = vpop.eup %3834 }
 0x422   : > { %v2769_v54 = vmul.f32 %v3835_v35, %v2767_v20  ;;  %vm2775_vm2 = vweird.f32 %v3835_v35 }
 0x423   : > { %vm2776_vm5 = vmor %vm2774_vm3, %vm2775_vm2 }
 0x424   : > { %v2770_v53 = vmul.f32 %v3835_v35, %v2769_v54 }
 0x426   : > { %v2771_v9 = vmul.f32 0.5, %v2770_v53 }
 0x428   : > { %v2772_v37 = vsub.f32 1.5, %v2771_v9 }
 0x42a   : > { %v2773_v10 = vmul.f32 %v3835_v35, %v2772_v37 }
 0x42c   : > { %v2777_v29 = vsel %vm2776_vm5, %v3835_v35, %v2773_v10 }
 0x42d   : > { %v2778_v38 = vsel %vm339_vm0, %v2761_v44, %v2777_v29 }
 0x42e   : > { %3620 = vmatmul.msk.f32.vlgmr.msra.gmra.mxu1 %vm640_vm4, %v2778_v38 }
 0x436   : > { %3621 = vmatmul.msk.f32.vlgmr.msrb.gmra.mxu1 %vm640_vm4, %v2852_v62 }
 0x4ab   : > { %v2801_v41 = vpop.f32.mrf.mxu1 }
 0x4ac   : > { %v2808_v34 = vmul.f32 %v2806_v16, %v2801_v41 }
 0x4ae   : > { %v2811_v27 = vrot.slane %v2808_v34, 1  ;;  %v2903_v12 = vperm.slane %v2808_v34, 1 }
 0x4b0   : > { %v2813_v17 = vmul.f32 %v2811_v27, %v2801_v41  ;;  %v2904_v25 = vmul.f32 %v3792_v57, %v2903_v12  ;;  %v2905_v50 = vmul.f32 %v3793_v2, %v2903_v12  ;;  %v2906_v55 = vmul.f32 %v3796_v58, %v2903_v12 }
 0x4b1   : > { %v2907_v14 = vmul.f32 %v3797_v59, %v2903_v12  ;;  %v2908_v32 = vmul.f32 %v3800_v7, %v2903_v12  ;;  %v2909_v56 = vmul.f32 %v3801_v63, %v2903_v12  ;;  %v2910_v19 = vmul.f32 %v3804_v0, %v2903_v12 }
 0x4b2   : > { %v2814_v42 = vsub.f32 %v2809_v21, %v2813_v17  ;;  %v2911_v15 = vmul.f32 %v3805_v1, %v2903_v12 }
 0x4b3   : > { %v2873_v5 = vpop.f32.mrf.mxu1 }
 0x4b4   : > { %v2912_v3 = vperm.slane %v2814_v42, 0  ;;  %v2880_v60 = vmul.f32 %v2878_v52, %v2873_v5 }
 0x4b6   : > { %v2913_v13 = vadd.f32 %v2912_v3, %v2904_v25  ;;  %v2914_v28 = vadd.f32 %v2912_v3, %v2905_v50  ;;  %v2915_v26 = vadd.f32 %v2912_v3, %v2906_v55  ;;  %v2916_v44 = vadd.f32 %v2912_v3, %v2907_v14 }
 0x4b7   : > { %v2883_v45 = vrot.slane %v2880_v60, 1  ;;  %v2917_v31 = vadd.f32 %v2912_v3, %v2908_v32  ;;  %v2918_v33 = vadd.f32 %v2912_v3, %v2909_v56  ;;  %v2919_v6 = vadd.f32 %v2912_v3, %v2910_v19 }
 0x4b8   : > { %v2929_v20 = vperm.slane %v2880_v60, 1  ;;  %v2920_v43 = vadd.f32 %v2912_v3, %v2911_v15  ;;  %v2921_v35 = vmax.f32 %v2913_v13, 0.0  ;;  %v2922_v8 = vmax.f32 %v2914_v28, 0.0 }
 0x4b9   : > { %v2885_v48 = vmul.f32 %v2883_v45, %v2873_v5  ;;  %v2923_v54 = vmax.f32 %v2915_v26, 0.0  ;;  %v2924_v53 = vmax.f32 %v2916_v44, 0.0  ;;  %v2925_v9 = vmax.f32 %v2917_v31, 0.0 }
 0x4ba   : > { %v2926_v37 = vmax.f32 %v2918_v33, 0.0  ;;  %v2927_v47 = vmax.f32 %v2919_v6, 0.0  ;;  %v2930_v10 = vmul.f32 %v2929_v20, %v4708_v61  ;;  %v2931_v29 = vmul.f32 %v2929_v20, %v4711_v18 }
 0x4bb   : > { %v2886_v22 = vsub.f32 %v2881_v46, %v2885_v48  ;;  %v2932_v38 = vmul.f32 %v2929_v20, %v4726_v24  ;;  %v2933_v39 = vmul.f32 %v2929_v20, %v4739_v36  ;;  %v2934_v62 = vmul.f32 %v2929_v20, %v4750_v23 }
 0x4bc   : > { %v2935_v4 = vmul.f32 %v2929_v20, %v4759_v30  ;;  %v2936_v16 = vmul.f32 %v2929_v20, %v4768_v51  ;;  %v2937_v41 = vmul.f32 %v2929_v20, %v4784_v11  ;;  %v2928_v23 = vmax.f32 %v2920_v43, 0.0 }
 0x4bd   : > { %v2938_v40 = vperm.slane %v2886_v22, 0 }
 0x4bf   : > { %v2939_v34 = vadd.f32 %v2938_v40, %v2930_v10  ;;  %v2940_v27 = vadd.f32 %v2938_v40, %v2931_v29  ;;  %v2941_v21 = vadd.f32 %v2938_v40, %v2932_v38  ;;  %v2942_v61 = vadd.f32 %v2938_v40, %v2933_v39 }
 0x4c0   : > { %v2943_v49 = vadd.f32 %v2938_v40, %v2934_v62  ;;  %v2944_v18 = vadd.f32 %v2938_v40, %v2935_v4  ;;  %v2945_v17 = vadd.f32 %v2938_v40, %v2936_v16  ;;  %v2946_v24 = vadd.f32 %v2938_v40, %v2937_v41 }
 0x4c1   : > { %v2947_v42 = vadd.f32 %v2939_v34, %v2921_v35  ;;  %v2948_v36 = vadd.f32 %v2940_v27, %v2922_v8  ;;  %v2949_v52 = vadd.f32 %v2941_v21, %v2923_v54  ;;  %v2950_v12 = vadd.f32 %v2942_v61, %v2924_v53 }
 0x4c2   : > { %v2951_v30 = vadd.f32 %v2943_v49, %v2925_v9  ;;  %v2952_v51 = vadd.f32 %v2944_v18, %v2926_v37  ;;  %v2953_v11 = vadd.f32 %v2945_v17, %v2927_v47  ;;  %v2954_v3 = vadd.f32 %v2946_v24, %v2928_v23 }
 0x4c3   : > { %v2955_v5 = vmax.f32 %v2947_v42, 0.0  ;;  %v2956_v57 = vmax.f32 %v2948_v36, 0.0  ;;  %v2957_v2 = vmax.f32 %v2949_v52, 0.0  ;;  %v2958_v58 = vmax.f32 %v2950_v12, 0.0 }
 0x4c4   : > { %v2959_v59 = vmax.f32 %v2951_v30, 0.0  ;;  %v2960_v7 = vmax.f32 %v2952_v51, 0.0  ;;  %v2961_v60 = vmax.f32 %v2953_v11, 0.0  ;;  %v2962_v63 = vmax.f32 %v2954_v3, 0.0 }
 0x4c5   : > { %2963 = vst [vmem:[%s332_s28] sm:$0xff] %v2955_v5 }
 0x4c6   : > { %2964 = vst [vmem:[%s332_s28 + $0x8] sm:$0xff] %v2956_v57 }
 0x4c7   : > { %2965 = vst [vmem:[%s332_s28 + $0x10] sm:$0xff] %v2957_v2 }
 0x4c8   : > { %2966 = vst [vmem:[%s332_s28 + $0x18] sm:$0xff] %v2958_v58 }
 0x4c9   : > { %2967 = vst [vmem:[%s332_s28 + $0x20] sm:$0xff] %v2959_v59 }
 0x4ca   : > { %2968 = vst [vmem:[%s332_s28 + $0x28] sm:$0xff] %v2960_v7 }
 0x4cb   : > { %2969 = vst [vmem:[%s332_s28 + $0x30] sm:$0xff] %v2961_v60 }
 0x4cc   : > { %2970 = vst [vmem:[%s332_s28 + $0x38] sm:$0xff] %v2962_v63 }
 0x4cd PF: > { %s19_s30 = sadd.s32 1, %s3842_s30  }
 0x4ce   : > { %p16_p4 = scmp.ge.s32.totalorder %s19_s30, 4  }
 0x4d0   :  { %18 = sbr.rel (!%p16_p4) target bundleno = 1 (0x1), region = 97 }

</bundles_post_ra>
